<compile_context>
chip_gen: v7x
topology: tpu7x:2x2x1
jax: 0.10.0
libtpu: 0.0.40
codegen_flags: <defaults>
</compile_context>

<pallas_src>
import functools

import jax
import jax.numpy as jnp
from jax import lax
from jax.experimental import pallas as pl
from jax.experimental.pallas import tpu as pltpu

EXPANSION = 4
BN_EPS = 1e-5
GUARD = 16  # sublane-aligned guard band around the y1 slab (bf16 packs 16 rows/vreg)


def _round_up(n, m):
    return ((n + m - 1) // m) * m


def _estimate_vmem_bytes(TH, W, Cpad, Ppad):
    """Rough per-step VMEM working set (double-buffered blocks + temporaries)."""
    Wp2 = W + 2
    Lslab = (TH + 2) * Wp2
    Lout = TH * Wp2
    total = GUARD + _round_up(Lslab + 1, 16)
    blocks = 2 * (Lslab * Cpad * 2 + Lout * Cpad * 2)            # x / out tiles, bf16, 2 bufs
    weights = 2 * ((Cpad * Ppad + 9 * Ppad * Ppad + Ppad * Cpad) * 2
                   + (2 * Ppad + Cpad) * 4 + Lslab * 4)
    scratch = total * Ppad * 2
    temps = (Lslab * Ppad * 4 + 2 * Lout * Ppad * 4
             + Lout * 3 * Ppad * 2 + Lout * Cpad * 4)
    return blocks + weights + scratch + temps


def _pick_tile_rows(H, W, Cpad, Ppad, max_tile_rows, budget_bytes=12 << 20):
    """Largest row-tile (divisor of H) whose working set fits the VMEM budget."""
    divisors = [d for d in range(1, H + 1) if H % d == 0]
    if max_tile_rows is not None:
        capped = [d for d in divisors if d <= max_tile_rows]
        divisors = capped if capped else divisors[:1]
    best = divisors[0]
    for d in divisors:
        if _estimate_vmem_bytes(d, W, Cpad, Ppad) <= budget_bytes:
            best = d
    return best


def _bottleneck_kernel(x_ref, mask_ref, w1_ref, b1_ref, w2_ref, b2_ref,
                       w3_ref, b3_ref, out_ref, slab_ref):
    # x_ref:    (1, 1, Lslab, Cpad) bf16   flattened (TH+2, W+2) input tile (halo rows included)
    # mask_ref: (Lslab, 1) f32             1 inside the image width, 0 on the W-padding columns
    # w1_ref:   (Cpad, Ppad) bf16          BN1 scale folded
    # w2_ref:   (3, 3*Ppad, Ppad) bf16     per kh: rows = [kw0; kw1; kw2], BN2 scale folded
    # w3_ref:   (Ppad, Cpad) bf16          BN3 scale folded
    # b*_ref:   (1, Ppad|Cpad) f32         folded BN biases
    # out_ref:  (1, 1, Lout, Cpad) bf16    flattened (TH, W+2) output tile (W-pad cols discarded)
    # slab_ref: (TOTAL, Ppad) bf16         [head guard | y1 slab | tail guard]
    total, Ppad = slab_ref.shape
    Lslab = x_ref.shape[2]
    Lout = out_ref.shape[2]
    Wp2 = (Lslab - Lout) // 2
    t = pl.program_id(1)
    last = pl.num_programs(1) - 1

    # Guard bands: the fused tap reads overhang the slab by one element each side.
    zeros_g = jnp.zeros((GUARD, Ppad), slab_ref.dtype)
    slab_ref[0:GUARD, :] = zeros_g
    slab_ref[total - GUARD:total, :] = zeros_g

    x2d = x_ref[0, 0]                                             # (Lslab, Cpad) bf16

    # ---- Stage 1: 1x1 conv (scale folded) + bias + ReLU — one whole-tile dot.
    # W-padding columns are zeroed with a broadcasted mask multiply; the slab
    # store is a single full-width store at a 16-sublane-aligned offset.
    y1 = jnp.dot(x2d, w1_ref[...], preferred_element_type=jnp.float32)
    y1 = jnp.maximum(y1 + b1_ref[...], 0.0) * mask_ref[...]
    slab_ref[GUARD:GUARD + Lslab, :] = y1.astype(slab_ref.dtype)

    # Zero the halo row that coincides with the image border (top of first tile,
    # bottom of last tile) — interior tiles keep real halo-row activations.
    zeros_row = jnp.zeros((Wp2, Ppad), slab_ref.dtype)

    @pl.when(t == 0)
    def _():
        slab_ref[GUARD:GUARD + Wp2, :] = zeros_row

    @pl.when(t == last)
    def _():
        slab_ref[GUARD + Lslab - Wp2:GUARD + Lslab, :] = zeros_row

    # ---- Stage 2: 3x3 conv (pad=1).  For each kh the three kw taps are
    # contiguous sublane-offset slices of the slab; lane-concatenating them
    # gives 3 dots with K = 3*Ppad (accumulator initialized from the first dot).
    acc = None
    for kh in range(3):
        s = GUARD + kh * Wp2 - 1
        a = jnp.concatenate([slab_ref[s:s + Lout, :],
                             slab_ref[s + 1:s + 1 + Lout, :],
                             slab_ref[s + 2:s + 2 + Lout, :]], axis=1)
        d = jnp.dot(a, w2_ref[kh], preferred_element_type=jnp.float32)
        acc = d if acc is None else acc + d
    y2 = jnp.maximum(acc + b2_ref[...], 0.0).astype(jnp.bfloat16)

    # ---- Stage 3: 1x1 conv + bias + identity residual + ReLU.
    # TODO(synk): residual is carried in bf16 (input dtype); pass an f32 copy of
    # x if skip-connection precision matters.
    y3 = jnp.dot(y2, w3_ref[...], preferred_element_type=jnp.float32) + b3_ref[...]
    y3 = y3 + x2d[Wp2:Wp2 + Lout, :].astype(jnp.float32)
    out_ref[0, 0] = jnp.maximum(y3, 0.0).astype(out_ref.dtype)


@functools.partial(jax.jit, static_argnames=("max_tile_rows",))
def bottleneck_forward(x_nchw, params, max_tile_rows=None):
    """HRNet Bottleneck forward (stride=1, downsample=None). x: (N, Cin, H, W)."""
    N, Cin, H, W = x_nchw.shape
    P = params["w1"].shape[1]
    Cout = P * EXPANSION
    assert Cin == Cout, "downsample=None requires inplanes == planes * expansion"
    # TODO(synk): stride>1 / downsample branch not implemented (identity residual only).

    Cpad = _round_up(Cin, 128)
    Ppad = _round_up(P, 128)
    TH = _pick_tile_rows(H, W, Cpad, Ppad, max_tile_rows)
    nT = H // TH
    Wp2 = W + 2
    Lslab = (TH + 2) * Wp2
    Lout = TH * Wp2
    total = GUARD + _round_up(Lslab + 1, 16)

    # NCHW -> NHWC, zero-pad spatially by 1, lane-pad channels, cast bf16.
    x = jnp.transpose(x_nchw, (0, 2, 3, 1)).astype(jnp.float32)
    x = jnp.pad(x, ((0, 0), (1, 1), (1, 1), (0, Cpad - Cin))).astype(jnp.bfloat16)
    # Overlapping row windows (1-row halo on each side), flattened per tile.
    rows = jnp.arange(nT)[:, None] * TH + jnp.arange(TH + 2)[None, :]
    x_tiles = x[:, rows].reshape(N, nT, Lslab, Cpad)

    # Mask zeroing the W-padding columns of the flattened slab.
    col = jnp.arange(Lslab) % Wp2
    mask = ((col >= 1) & (col <= W)).astype(jnp.float32).reshape(Lslab, 1)

    # Fold BN (eval mode) scales into the conv weights; biases stay f32.
    w1 = params["w1"] * params["s1"][None, :]
    w1 = jnp.pad(w1, ((0, Cpad - Cin), (0, Ppad - P))).astype(jnp.bfloat16)
    w2 = params["w2"] * params["s2"][None, None, None, :]
    w2 = jnp.pad(w2, ((0, 0), (0, 0), (0, Ppad - P), (0, Ppad - P)))
    w2f = w2.reshape(3, 3 * Ppad, Ppad).astype(jnp.bfloat16)     # kh -> [kw0; kw1; kw2] rows
    w3 = params["w3"] * params["s3"][None, :]
    w3 = jnp.pad(w3, ((0, Ppad - P), (0, Cpad - Cout))).astype(jnp.bfloat16)
    b1 = jnp.pad(params["b1"], (0, Ppad - P)).reshape(1, Ppad).astype(jnp.float32)
    b2 = jnp.pad(params["b2"], (0, Ppad - P)).reshape(1, Ppad).astype(jnp.float32)
    b3 = jnp.pad(params["b3"], (0, Cpad - Cout)).reshape(1, Cpad).astype(jnp.float32)

    est = _estimate_vmem_bytes(TH, W, Cpad, Ppad)
    vmem_limit = int(min(max(2 * est + (8 << 20), 32 << 20), 56 << 20))

    full2 = lambda n, t: (0, 0)
    full3 = lambda n, t: (0, 0, 0)

    out = pl.pallas_call(
        _bottleneck_kernel,
        out_shape=jax.ShapeDtypeStruct((N, nT, Lout, Cpad), jnp.bfloat16),
        grid_spec=pltpu.PrefetchScalarGridSpec(
            num_scalar_prefetch=0,
            grid=(N, nT),
            in_specs=[
                pl.BlockSpec((1, 1, Lslab, Cpad), lambda n, t: (n, t, 0, 0)),
                pl.BlockSpec((Lslab, 1), full2),
                pl.BlockSpec((Cpad, Ppad), full2),
                pl.BlockSpec((1, Ppad), full2),
                pl.BlockSpec((3, 3 * Ppad, Ppad), full3),
                pl.BlockSpec((1, Ppad), full2),
                pl.BlockSpec((Ppad, Cpad), full2),
                pl.BlockSpec((1, Cpad), full2),
            ],
            out_specs=pl.BlockSpec((1, 1, Lout, Cpad), lambda n, t: (n, t, 0, 0)),
            scratch_shapes=[pltpu.VMEM((total, Ppad), jnp.bfloat16)],
        ),
        compiler_params=pltpu.CompilerParams(
            dimension_semantics=("parallel", "parallel"),
            vmem_limit_bytes=vmem_limit),
    )(x_tiles, mask, w1, b1, w2f, b2, w3, b3)

    # Drop the W-padding columns and channel padding, back to NCHW f32.
    out = out.reshape(N, nT, TH, Wp2, Cpad)[:, :, :, 1:W + 1, :Cout]
    out = out.reshape(N, H, W, Cout).astype(jnp.float32)
    return jnp.transpose(out, (0, 3, 1, 2))


def init_params(key, inplanes, planes):
    """Deterministic synthetic parameters; BN (eval mode) folded to scale/bias."""
    P = planes
    Cout = planes * EXPANSION
    ks = jax.random.split(key, 15)

    def bn_fold(kg, kb, km, kv, c):
        gamma = 1.0 + 0.1 * jax.random.normal(kg, (c,), jnp.float32)
        beta = 0.1 * jax.random.normal(kb, (c,), jnp.float32)
        mean = 0.1 * jax.random.normal(km, (c,), jnp.float32)
        var = jnp.abs(jax.random.normal(kv, (c,), jnp.float32)) + 0.5
        scale = gamma / jnp.sqrt(var + BN_EPS)
        bias = beta - mean * scale
        return scale, bias

    w1 = 0.1 * jax.random.normal(ks[0], (inplanes, P), jnp.float32)       # 1x1
    w2 = 0.1 * jax.random.normal(ks[1], (3, 3, P, P), jnp.float32)        # 3x3 HWIO
    w3 = 0.1 * jax.random.normal(ks[2], (P, Cout), jnp.float32)           # 1x1
    s1, b1 = bn_fold(ks[3], ks[4], ks[5], ks[6], P)
    s2, b2 = bn_fold(ks[7], ks[8], ks[9], ks[10], P)
    s3, b3 = bn_fold(ks[11], ks[12], ks[13], ks[14], Cout)
    return dict(w1=w1, w2=w2, w3=w3, s1=s1, b1=b1, s2=s2, b2=b2, s3=s3, b3=b3)


def reference(x_nchw, params):
    """Pure-JAX f32 reference (lax convs) for correctness checking."""
    x = jnp.transpose(x_nchw, (0, 2, 3, 1)).astype(jnp.float32)
    dn = ("NHWC", "HWIO", "NHWC")
    P = params["w1"].shape[1]
    y = lax.conv_general_dilated(x, params["w1"].reshape(1, 1, -1, P),
                                 (1, 1), "VALID", dimension_numbers=dn)
    y = jnp.maximum(y * params["s1"] + params["b1"], 0.0)
    y = lax.conv_general_dilated(y, params["w2"],
                                 (1, 1), "SAME", dimension_numbers=dn)
    y = jnp.maximum(y * params["s2"] + params["b2"], 0.0)
    y = lax.conv_general_dilated(y, params["w3"].reshape(1, 1, P, -1),
                                 (1, 1), "VALID", dimension_numbers=dn)
    y = y * params["s3"] + params["b3"]
    y = jnp.maximum(y + x, 0.0)
    return jnp.transpose(y, (0, 3, 1, 2))


if __name__ == "__main__":
    # Small config with inplanes == planes * expansion (downsample=None case).
    N, inplanes, planes, H, W = 2, 32, 8, 16, 16
    key = jax.random.PRNGKey(0)
    kx, kp = jax.random.split(key)
    x = jax.random.normal(kx, (N, inplanes, H, W), jnp.float32)    # NCHW input
    params = init_params(kp, inplanes, planes)

    # max_tile_rows=8 -> 2 row-tiles per image: exercises the halo path.
    out = jax.block_until_ready(bottleneck_forward(x, params, max_tile_rows=8))
    ref = jax.block_until_ready(reference(x, params))

    assert out.shape == (N, planes * EXPANSION, H, W)
    max_err = float(jnp.max(jnp.abs(out - ref)))
    # bf16 operands / bf16 output / bf16 residual vs f32 reference -> loose tolerance.
    assert jnp.allclose(out, ref, atol=5e-2, rtol=5e-2), f"mismatch vs ref (max {max_err})"
    print("KERNEL_OK")
</pallas_src>

<mosaic_0001>
module attributes {stable_mosaic.version = 11 : i64} {
  func.func @_bottleneck_kernel(%arg0: i32, %arg1: i32, %arg2: memref<1x1x180x128xbf16, #tpu.memory_space<vmem>>, %arg3: memref<180x1xf32, #tpu.memory_space<vmem>>, %arg4: memref<128x128xbf16, #tpu.memory_space<vmem>>, %arg5: memref<1x128xf32, #tpu.memory_space<vmem>>, %arg6: memref<3x384x128xbf16, #tpu.memory_space<vmem>>, %arg7: memref<1x128xf32, #tpu.memory_space<vmem>>, %arg8: memref<128x128xbf16, #tpu.memory_space<vmem>>, %arg9: memref<1x128xf32, #tpu.memory_space<vmem>>, %arg10: memref<1x1x144x128xbf16, #tpu.memory_space<vmem>>, %arg11: memref<208x128xbf16, #tpu.memory_space<vmem>>) attributes {dimension_semantics = [#tpu.dimension_semantics<parallel>, #tpu.dimension_semantics<parallel>], iteration_bounds = array<i64: 2, 2>, scalar_prefetch = 0 : i64, scratch_operands = 1 : i64, tpu.core_type = #tpu.core_type<tc>, window_params = [{transform_indices = @transform_0, window_bounds = array<i64: 1, 1, 180, 128>}, {pipeline_mode = #tpu.pipeline_mode<synchronous>, transform_indices = @transform_1, window_bounds = array<i64: 180, 1>}, {pipeline_mode = #tpu.pipeline_mode<synchronous>, transform_indices = @transform_2, window_bounds = array<i64: 128, 128>}, {pipeline_mode = #tpu.pipeline_mode<synchronous>, transform_indices = @transform_3, window_bounds = array<i64: 1, 128>}, {pipeline_mode = #tpu.pipeline_mode<synchronous>, transform_indices = @transform_4, window_bounds = array<i64: 3, 384, 128>}, {pipeline_mode = #tpu.pipeline_mode<synchronous>, transform_indices = @transform_5, window_bounds = array<i64: 1, 128>}, {pipeline_mode = #tpu.pipeline_mode<synchronous>, transform_indices = @transform_6, window_bounds = array<i64: 128, 128>}, {pipeline_mode = #tpu.pipeline_mode<synchronous>, transform_indices = @transform_7, window_bounds = array<i64: 1, 128>}, {transform_indices = @transform_8, window_bounds = array<i64: 1, 1, 144, 128>}]} {
    %cst = arith.constant 0.000000e+00 : bf16
    %0 = vector.broadcast %cst : bf16 to vector<16x128xbf16>
    %c0 = arith.constant 0 : index
    %c0_0 = arith.constant 0 : index
    %1 = vector.load %arg11[%c0, %c0_0] : memref<208x128xbf16, #tpu.memory_space<vmem>>, vector<16x128xbf16>
    tpu.vector_store %arg11[%c0, %c0_0], %0 {strides = array<i32>} : memref<208x128xbf16, #tpu.memory_space<vmem>>, vector<16x128xbf16>,
    %c192 = arith.constant 192 : index
    %c0_1 = arith.constant 0 : index
    %2 = vector.load %arg11[%c192, %c0_1] : memref<208x128xbf16, #tpu.memory_space<vmem>>, vector<16x128xbf16>
    tpu.vector_store %arg11[%c192, %c0_1], %0 {strides = array<i32>} : memref<208x128xbf16, #tpu.memory_space<vmem>>, vector<16x128xbf16>,
    %c0_2 = arith.constant 0 : index
    %c0_3 = arith.constant 0 : index
    %c0_4 = arith.constant 0 : index
    %c0_5 = arith.constant 0 : index
    %3 = vector.load %arg2[%c0_2, %c0_3, %c0_4, %c0_5] : memref<1x1x180x128xbf16, #tpu.memory_space<vmem>>, vector<1x1x180x128xbf16>
    %4 = vector.shape_cast %3 : vector<1x1x180x128xbf16> to vector<180x128xbf16>
    %c0_6 = arith.constant 0 : index
    %c0_7 = arith.constant 0 : index
    %5 = vector.load %arg4[%c0_6, %c0_7] : memref<128x128xbf16, #tpu.memory_space<vmem>>, vector<128x128xbf16>
    %cst_8 = arith.constant dense<0.000000e+00> : vector<180x128xf32>
    %6 = tpu.matmul %4, %5, %cst_8 {dimension_numbers = #tpu.dot_dimension_numbers<[1], [0], [0], [1], [0, 0, 1, 1], [], []>} : vector<180x128xbf16>, vector<128x128xbf16>, vector<180x128xf32> -> vector<180x128xf32>
    %c0_9 = arith.constant 0 : index
    %c0_10 = arith.constant 0 : index
    %7 = vector.load %arg5[%c0_9, %c0_10] : memref<1x128xf32, #tpu.memory_space<vmem>>, vector<1x128xf32>
    %8 = vector.broadcast %7 : vector<1x128xf32> to vector<180x128xf32>
    %9 = arith.addf %6, %8 : vector<180x128xf32>
    %cst_11 = arith.constant 0.000000e+00 : f32
    %10 = vector.broadcast %cst_11 : f32 to vector<180x128xf32>
    %11 = arith.maximumf %9, %10 : vector<180x128xf32>
    %c0_12 = arith.constant 0 : index
    %c0_13 = arith.constant 0 : index
    %12 = vector.load %arg3[%c0_12, %c0_13] : memref<180x1xf32, #tpu.memory_space<vmem>>, vector<180x1xf32>
    %13 = vector.broadcast %12 : vector<180x1xf32> to vector<180x128xf32>
    %14 = arith.mulf %11, %13 : vector<180x128xf32>
    %15 = arith.truncf %14 : vector<180x128xf32> to vector<180x128xbf16>
    %c16 = arith.constant 16 : index
    %c0_14 = arith.constant 0 : index
    %16 = vector.load %arg11[%c16, %c0_14] : memref<208x128xbf16, #tpu.memory_space<vmem>>, vector<180x128xbf16>
    tpu.vector_store %arg11[%c16, %c0_14], %15 {strides = array<i32>} : memref<208x128xbf16, #tpu.memory_space<vmem>>, vector<180x128xbf16>,
    %cst_15 = arith.constant 0.000000e+00 : bf16
    %17 = vector.broadcast %cst_15 : bf16 to vector<18x128xbf16>
    %c0_i32 = arith.constant 0 : i32
    %18 = arith.cmpi eq, %arg1, %c0_i32 : i32
    %19 = arith.extui %18 : i1 to i32
    %c0_i32_16 = arith.constant 0 : i32
    %20 = arith.cmpi ne, %19, %c0_i32_16 : i32
    scf.if %20 {
      %c16_51 = arith.constant 16 : index
      %c0_52 = arith.constant 0 : index
      %67 = vector.load %arg11[%c16_51, %c0_52] : memref<208x128xbf16, #tpu.memory_space<vmem>>, vector<18x128xbf16>
      tpu.vector_store %arg11[%c16_51, %c0_52], %17 {strides = array<i32>} : memref<208x128xbf16, #tpu.memory_space<vmem>>, vector<18x128xbf16>,
    } else {
    }
    %c1_i32 = arith.constant 1 : i32
    %21 = arith.cmpi eq, %arg1, %c1_i32 : i32
    %22 = arith.extui %21 : i1 to i32
    %c0_i32_17 = arith.constant 0 : i32
    %23 = arith.cmpi ne, %22, %c0_i32_17 : i32
    scf.if %23 {
      %c178 = arith.constant 178 : index
      %c0_51 = arith.constant 0 : index
      %67 = vector.load %arg11[%c178, %c0_51] : memref<208x128xbf16, #tpu.memory_space<vmem>>, vector<18x128xbf16>
      tpu.vector_store %arg11[%c178, %c0_51], %17 {strides = array<i32>} : memref<208x128xbf16, #tpu.memory_space<vmem>>, vector<18x128xbf16>,
    } else {
    }
    %c15 = arith.constant 15 : index
    %c0_18 = arith.constant 0 : index
    %24 = vector.load %arg11[%c15, %c0_18] : memref<208x128xbf16, #tpu.memory_space<vmem>>, vector<144x128xbf16>
    %c16_19 = arith.constant 16 : index
    %c0_20 = arith.constant 0 : index
    %25 = vector.load %arg11[%c16_19, %c0_20] : memref<208x128xbf16, #tpu.memory_space<vmem>>, vector<144x128xbf16>
    %c17 = arith.constant 17 : index
    %c0_21 = arith.constant 0 : index
    %26 = vector.load %arg11[%c17, %c0_21] : memref<208x128xbf16, #tpu.memory_space<vmem>>, vector<144x128xbf16>
    %27 = tpu.concatenate %24, %25, %26 in 1 : vector<144x128xbf16>, vector<144x128xbf16>, vector<144x128xbf16> -> vector<144x384xbf16>
    %c0_22 = arith.constant 0 : index
    %c0_23 = arith.constant 0 : index
    %c0_24 = arith.constant 0 : index
    %28 = vector.load %arg6[%c0_22, %c0_23, %c0_24] : memref<3x384x128xbf16, #tpu.memory_space<vmem>>, vector<1x384x128xbf16>
    %29 = vector.shape_cast %28 : vector<1x384x128xbf16> to vector<384x128xbf16>
    %cst_25 = arith.constant dense<0.000000e+00> : vector<144x128xf32>
    %30 = tpu.matmul %27, %29, %cst_25 {dimension_numbers = #tpu.dot_dimension_numbers<[1], [0], [0], [1], [0, 0, 1, 1], [], []>} : vector<144x384xbf16>, vector<384x128xbf16>, vector<144x128xf32> -> vector<144x128xf32>
    %c33 = arith.constant 33 : index
    %c0_26 = arith.constant 0 : index
    %31 = vector.load %arg11[%c33, %c0_26] : memref<208x128xbf16, #tpu.memory_space<vmem>>, vector<144x128xbf16>
    %c34 = arith.constant 34 : index
    %c0_27 = arith.constant 0 : index
    %32 = vector.load %arg11[%c34, %c0_27] : memref<208x128xbf16, #tpu.memory_space<vmem>>, vector<144x128xbf16>
    %c35 = arith.constant 35 : index
    %c0_28 = arith.constant 0 : index
    %33 = vector.load %arg11[%c35, %c0_28] : memref<208x128xbf16, #tpu.memory_space<vmem>>, vector<144x128xbf16>
    %34 = tpu.concatenate %31, %32, %33 in 1 : vector<144x128xbf16>, vector<144x128xbf16>, vector<144x128xbf16> -> vector<144x384xbf16>
    %c1 = arith.constant 1 : index
    %c0_29 = arith.constant 0 : index
    %c0_30 = arith.constant 0 : index
    %35 = vector.load %arg6[%c1, %c0_29, %c0_30] : memref<3x384x128xbf16, #tpu.memory_space<vmem>>, vector<1x384x128xbf16>
    %36 = vector.shape_cast %35 : vector<1x384x128xbf16> to vector<384x128xbf16>
    %cst_31 = arith.constant dense<0.000000e+00> : vector<144x128xf32>
    %37 = tpu.matmul %34, %36, %cst_31 {dimension_numbers = #tpu.dot_dimension_numbers<[1], [0], [0], [1], [0, 0, 1, 1], [], []>} : vector<144x384xbf16>, vector<384x128xbf16>, vector<144x128xf32> -> vector<144x128xf32>
    %38 = arith.addf %30, %37 : vector<144x128xf32>
    %c51 = arith.constant 51 : index
    %c0_32 = arith.constant 0 : index
    %39 = vector.load %arg11[%c51, %c0_32] : memref<208x128xbf16, #tpu.memory_space<vmem>>, vector<144x128xbf16>
    %c52 = arith.constant 52 : index
    %c0_33 = arith.constant 0 : index
    %40 = vector.load %arg11[%c52, %c0_33] : memref<208x128xbf16, #tpu.memory_space<vmem>>, vector<144x128xbf16>
    %c53 = arith.constant 53 : index
    %c0_34 = arith.constant 0 : index
    %41 = vector.load %arg11[%c53, %c0_34] : memref<208x128xbf16, #tpu.memory_space<vmem>>, vector<144x128xbf16>
    %42 = tpu.concatenate %39, %40, %41 in 1 : vector<144x128xbf16>, vector<144x128xbf16>, vector<144x128xbf16> -> vector<144x384xbf16>
    %c2 = arith.constant 2 : index
    %c0_35 = arith.constant 0 : index
    %c0_36 = arith.constant 0 : index
    %43 = vector.load %arg6[%c2, %c0_35, %c0_36] : memref<3x384x128xbf16, #tpu.memory_space<vmem>>, vector<1x384x128xbf16>
    %44 = vector.shape_cast %43 : vector<1x384x128xbf16> to vector<384x128xbf16>
    %cst_37 = arith.constant dense<0.000000e+00> : vector<144x128xf32>
    %45 = tpu.matmul %42, %44, %cst_37 {dimension_numbers = #tpu.dot_dimension_numbers<[1], [0], [0], [1], [0, 0, 1, 1], [], []>} : vector<144x384xbf16>, vector<384x128xbf16>, vector<144x128xf32> -> vector<144x128xf32>
    %46 = arith.addf %38, %45 : vector<144x128xf32>
    %c0_38 = arith.constant 0 : index
    %c0_39 = arith.constant 0 : index
    %47 = vector.load %arg7[%c0_38, %c0_39] : memref<1x128xf32, #tpu.memory_space<vmem>>, vector<1x128xf32>
    %48 = vector.broadcast %47 : vector<1x128xf32> to vector<144x128xf32>
    %49 = arith.addf %46, %48 : vector<144x128xf32>
    %cst_40 = arith.constant 0.000000e+00 : f32
    %50 = vector.broadcast %cst_40 : f32 to vector<144x128xf32>
    %51 = arith.maximumf %49, %50 : vector<144x128xf32>
    %52 = arith.truncf %51 : vector<144x128xf32> to vector<144x128xbf16>
    %c0_41 = arith.constant 0 : index
    %c0_42 = arith.constant 0 : index
    %53 = vector.load %arg8[%c0_41, %c0_42] : memref<128x128xbf16, #tpu.memory_space<vmem>>, vector<128x128xbf16>
    %cst_43 = arith.constant dense<0.000000e+00> : vector<144x128xf32>
    %54 = tpu.matmul %52, %53, %cst_43 {dimension_numbers = #tpu.dot_dimension_numbers<[1], [0], [0], [1], [0, 0, 1, 1], [], []>} : vector<144x128xbf16>, vector<128x128xbf16>, vector<144x128xf32> -> vector<144x128xf32>
    %c0_44 = arith.constant 0 : index
    %c0_45 = arith.constant 0 : index
    %55 = vector.load %arg9[%c0_44, %c0_45] : memref<1x128xf32, #tpu.memory_space<vmem>>, vector<1x128xf32>
    %56 = vector.broadcast %55 : vector<1x128xf32> to vector<144x128xf32>
    %57 = arith.addf %54, %56 : vector<144x128xf32>
    %58 = vector.extract_strided_slice %4 {offsets = [18, 0], sizes = [144, 128], strides = [1, 1]} : vector<180x128xbf16> to vector<144x128xbf16>
    %59 = arith.extf %58 : vector<144x128xbf16> to vector<144x128xf32>
    %60 = arith.addf %57, %59 : vector<144x128xf32>
    %cst_46 = arith.constant 0.000000e+00 : f32
    %61 = vector.broadcast %cst_46 : f32 to vector<144x128xf32>
    %62 = arith.maximumf %60, %61 : vector<144x128xf32>
    %63 = arith.truncf %62 : vector<144x128xf32> to vector<144x128xbf16>
    %c0_47 = arith.constant 0 : index
    %c0_48 = arith.constant 0 : index
    %c0_49 = arith.constant 0 : index
    %c0_50 = arith.constant 0 : index
    %64 = vector.load %arg10[%c0_47, %c0_48, %c0_49, %c0_50] : memref<1x1x144x128xbf16, #tpu.memory_space<vmem>>, vector<1x1x144x128xbf16>
    %65 = vector.shape_cast %64 : vector<1x1x144x128xbf16> to vector<144x128xbf16>
    %66 = vector.shape_cast %63 : vector<144x128xbf16> to vector<1x1x144x128xbf16>
    tpu.vector_store %arg10[%c0_47, %c0_48, %c0_49, %c0_50], %66 {strides = array<i32>} : memref<1x1x144x128xbf16, #tpu.memory_space<vmem>>, vector<1x1x144x128xbf16>,
    return
  }
  func.func @transform_0(%arg0: i32, %arg1: i32) -> (i32, i32, i32, i32) {
    %c0_i32 = arith.constant 0 : i32
    %c0_i32_0 = arith.constant 0 : i32
    %c0_i32_1 = arith.constant 0 : i32
    return %arg0, %arg1, %c0_i32, %c0_i32_0 : i32, i32, i32, i32
  }
  func.func @transform_1(%arg0: i32, %arg1: i32) -> (i32, i32) {
    %c0_i32 = arith.constant 0 : i32
    %c0_i32_0 = arith.constant 0 : i32
    %c0_i32_1 = arith.constant 0 : i32
    return %c0_i32, %c0_i32_0 : i32, i32
  }
  func.func @transform_2(%arg0: i32, %arg1: i32) -> (i32, i32) {
    %c0_i32 = arith.constant 0 : i32
    %c0_i32_0 = arith.constant 0 : i32
    %c0_i32_1 = arith.constant 0 : i32
    return %c0_i32, %c0_i32_0 : i32, i32
  }
  func.func @transform_3(%arg0: i32, %arg1: i32) -> (i32, i32) {
    %c0_i32 = arith.constant 0 : i32
    %c0_i32_0 = arith.constant 0 : i32
    %c0_i32_1 = arith.constant 0 : i32
    return %c0_i32, %c0_i32_0 : i32, i32
  }
  func.func @transform_4(%arg0: i32, %arg1: i32) -> (i32, i32, i32) {
    %c0_i32 = arith.constant 0 : i32
    %c0_i32_0 = arith.constant 0 : i32
    %c0_i32_1 = arith.constant 0 : i32
    %c0_i32_2 = arith.constant 0 : i32
    return %c0_i32, %c0_i32_0, %c0_i32_1 : i32, i32, i32
  }
  func.func @transform_5(%arg0: i32, %arg1: i32) -> (i32, i32) {
    %c0_i32 = arith.constant 0 : i32
    %c0_i32_0 = arith.constant 0 : i32
    %c0_i32_1 = arith.constant 0 : i32
    return %c0_i32, %c0_i32_0 : i32, i32
  }
  func.func @transform_6(%arg0: i32, %arg1: i32) -> (i32, i32) {
    %c0_i32 = arith.constant 0 : i32
    %c0_i32_0 = arith.constant 0 : i32
    %c0_i32_1 = arith.constant 0 : i32
    return %c0_i32, %c0_i32_0 : i32, i32
  }
  func.func @transform_7(%arg0: i32, %arg1: i32) -> (i32, i32) {
    %c0_i32 = arith.constant 0 : i32
    %c0_i32_0 = arith.constant 0 : i32
    %c0_i32_1 = arith.constant 0 : i32
    return %c0_i32, %c0_i32_0 : i32, i32
  }
  func.func @transform_8(%arg0: i32, %arg1: i32) -> (i32, i32, i32, i32) {
    %c0_i32 = arith.constant 0 : i32
    %c0_i32_0 = arith.constant 0 : i32
    %c0_i32_1 = arith.constant 0 : i32
    return %arg0, %arg1, %c0_i32, %c0_i32_0 : i32, i32, i32, i32
  }
}

</mosaic_0001>

<bundles_post_ra>
// kernel: bottleneck_forward.1
= control target key start
LH: loop header
LB: loop body
LE: loop exit
PB: predicated region body
PF: predicated region fallthrough
CT: control target
= control target key end

     0   :  { %s4589_s27 = smov 0   ;;  %s4591_s28 = smov 0   ;;  %s6025_s0 = inlined_call_operand.vmem [shape: bf16[2,2,180,128], index: 0, kind: input, shape index: {}]   ;;  %s6026_s1 = inlined_call_operand.vmem [shape: f32[180,1], index: 1, kind: input, shape index: {}]   ;;  %s6027_s2 = inlined_call_operand.vmem [shape: bf16[128,128], index: 2, kind: input, shape index: {}]   ;;  %s6028_s3 = inlined_call_operand.vmem [shape: f32[1,128], index: 3, kind: input, shape index: {}]   ;;  %s6029_s4 = inlined_call_operand.vmem [shape: bf16[3,384,128], index: 4, kind: input, shape index: {}]   ;;  %s6030_s5 = inlined_call_operand.vmem [shape: f32[1,128], index: 5, kind: input, shape index: {}]   ;;  %s6031_s6 = inlined_call_operand.vmem [shape: bf16[128,128], index: 6, kind: input, shape index: {}]   ;;  %s6032_s7 = inlined_call_operand.vmem [shape: f32[1,128], index: 7, kind: input, shape index: {}]   ;;  %s6033_s8 = inlined_call_operand.vmem [shape: bf16[2,2,144,128], index: 8, kind: output, shape index: {}]  }
   0x1   :  { %s4593_s29 = smov 0   ;;  %s4595_s30 = smov 0  }
   0x2   :  { %s4597_s9 = smov 0  }
   0x3 LB: > { %s27_s10 = sadd.s32 1, %s4529_s29  ;;  %s30_s11 = sadd.s32 1, %s4533_s30  ;;  %s4537_s9 = sphi %s4597_s9, %s18_s9   ;;  %s4533_s30 = sphi %s4595_s30, %s6184_s30   ;;  %s4529_s29 = sphi %s4593_s29, %s6183_s29   ;;  %s4525_s28 = sphi %s4591_s28, %s6182_s28   ;;  %s4521_s27 = sphi %s4589_s27, %s6181_s27  }
   0x4   : > { %p28_p0 = scmp.ge.s32.totalorder %s27_s10, 2  ;;  %p3479_p1 = scmp.ge.s32.totalorder %s4537_s9, 1 }
   0x5   : > { %p282_p2 = scmp.lt.s32.totalorder %s4537_s9, 5 }
   0x6   : > { %s6186_s10 = smov (%p28_p0, %s27_s10), 0  ;;  %s6188_s11 = smov (!%p28_p0, %s30_s11), %s4533_s30 }
   0x7   : > { %p283_p3 = pnand %p3479_p1, %p282_p2  ;;  %p32_p4 = scmp.ge.s32.totalorder %s6188_s11, 2 }
   0x9   : > { %s6190_s11 = smov (%p32_p4, %s6188_s11), 0  ;;  %286 = sbr.rel (%p283_p3) target bundleno = 1013 (0x3f5), region = 52 }
  0x10   : > { %v4387_v0 = vld [vmem:[%s6027_s2] sm:$0xff]   ;;  %p324_p5 = scmp.lt.s32.totalorder %s4525_s28, 1  ;;  %v4388_v1 = vld [vmem:[%s6027_s2 + $0x8] sm:$0xff]   ;;  %p326_p6 = scmp.lt.s32.totalorder %s4521_s27, 1  ;;  %v4389_v2 = vld [vmem:[%s6027_s2 + $0x10] sm:$0xff]   ;;  %v4539_v6 = vmov 0  }
  0x11   : > { %4072 = vmatprep.subr.bf16.mxu0 %v4387_v0  ;;  %v4390_v3 = vld [vmem:[%s6027_s2 + $0x18] sm:$0xff]   ;;  %v660_v4 = vld [vmem:[%s6026_s1] sm:$0xff]  ;;  %v662_v5 = vld [vmem:[%s6026_s1 + $0x10] sm:$0xff]  ;;  %4385 = vset.pattern.permute.xlu0 %v4539_v6  ;;  %343 = vst [vmem:[#allocation2] sm:$0xff] %v4539_v6  ;;  %p3503_p7 = scmp.ne.s32.totalorder %s4521_s27, 0 }
  0x12   : > { %s6192_s28 = smov (!%p324_p5, %s4525_s28), 1  ;;  %4073 = vmatpush3.bf16.msra.mxu0 %v4387_v0  ;;  %344 = vst [vmem:[#allocation2 + $0x60] sm:$0xff] %v4539_v6  ;;  %4386 = vset.pattern.permute.xlu1 %v4539_v6  ;;  %v661_v8 = vld [vmem:[%s6026_s1 + $0x8] sm:$0xff]  ;;  %v663_v9 = vld [vmem:[%s6026_s1 + $0x18] sm:$0xff]  ;;  %v4391_v10 = vld [vmem:[%s6027_s2 + $0x20] sm:$0xff]  }
  0x13   : > { %s327_s16 = scalar_select %p326_p6, %s4521_s27, 1  ;;  %4074 = vmatprep.subr.bf16.mxu0 %v4388_v1  ;;  %685 = vperm.xlu0 %4385, %v660_v4   ;;  %v664_v11 = vld [vmem:[%s6026_s1 + $0x20] sm:$0xff]  ;;  %v665_v12 = vld [vmem:[%s6026_s1 + $0x28] sm:$0xff]  ;;  %v666_v14 = vld [vmem:[%s6026_s1 + $0x30] sm:$0xff] }
  0x14   : > { %s4337_s19 = smul.u32 46, %s6192_s28  ;;  %695 = vperm.xlu1 %4386, %v662_v5   ;;  %v4392_v13 = vld [vmem:[%s6027_s2 + $0x28] sm:$0xff]   ;;  %v667_v15 = vld [vmem:[%s6026_s1 + $0x38] sm:$0xff]  ;;  %v4393_v16 = vld [vmem:[%s6027_s2 + $0x30] sm:$0xff]  }
  0x15   : > { %s4336_s20 = smul.u32 23, %s327_s16  ;;  %v668_v17 = vld [vmem:[%s6026_s1 + $0x40] sm:$0xff]  ;;  %v669_v18 = vld [vmem:[%s6026_s1 + $0x48] sm:$0xff]  ;;  %v4394_v19 = vld [vmem:[%s6027_s2 + $0x38] sm:$0xff]  }
  0x16   : > { %s4338_s21 = smul.u32 18, %s327_s16  ;;  %4075 = vmatpush3.bf16.msra.mxu0 %v4388_v1  ;;  %v670_v21 = vld [vmem:[%s6026_s1 + $0x50] sm:$0xff]  ;;  %v671_v22 = vld [vmem:[%s6026_s1 + $0x58] sm:$0xff]  ;;  %v672_v24 = vld [vmem:[%s6026_s1 + $0x60] sm:$0xff] }
  0x17   : > { %s330_s22 = sadd.s32 %s4337_s19, %s4336_s20  ;;  %s4339_s23 = smul.u32 36, %s6192_s28  ;;  %4076 = vmatprep.subr.bf16.mxu0 %v4389_v2  ;;  %690 = vperm.xlu0 %4385, %v661_v8   ;;  %v673_v25 = vld [vmem:[%s6026_s1 + $0x68] sm:$0xff]  ;;  %v674_v27 = vld [vmem:[%s6026_s1 + $0x70] sm:$0xff]  ;;  %v675_v29 = vld [vmem:[%s6026_s1 + $0x78] sm:$0xff] }
  0x18   : > { %s3480_s26 = sshll.u32 %s330_s22, 2  ;;  %700 = vperm.xlu1 %4386, %v663_v9   ;;  %v676_v30 = vld [vmem:[%s6026_s1 + $0x80] sm:$0xff]  ;;  %v677_v31 = vld [vmem:[%s6026_s1 + $0x88] sm:$0xff]  ;;  %v678_v33 = vld [vmem:[%s6026_s1 + $0x90] sm:$0xff] }
  0x19   : > { %s4644_s16 = scalar_lea.vmem %s6025_s0, %s3480_s26  ;;  %s339_s28 = sadd.s32 %s4339_s23, %s4338_s21  ;;  %v679_v35 = vld [vmem:[%s6026_s1 + $0x98] sm:$0xff]  ;;  %v680_v36 = vld [vmem:[%s6026_s1 + $0xa0] sm:$0xff]  ;;  %v681_v37 = vld [vmem:[%s6026_s1 + $0xa8] sm:$0xff] }
  0x1a   : > { %s3481_s19 = sshll.u32 %s339_s28, 2  ;;  %v4395_v7 = vld [vmem:[%s4644_s16] sm:$0xff]   ;;  %4077 = vmatpush3.bf16.msra.mxu0 %v4389_v2  ;;  %v4689_v20 = vld [vmem:[%s4644_s16 + $0x8] sm:$0xff]   ;;  %v4698_v23 = vld [vmem:[%s4644_s16 + $0x10] sm:$0xff]  }
  0x1b   : > { %s4650_s24 = scalar_lea.vmem %s6033_s8, %s3481_s19  ;;  %4078 = vmatprep.subr.bf16.mxu0 %v4390_v3  ;;  %4088 = vmatprep.mubr.bf16.mxu0 %v4395_v7  ;;  %6101 = vst [vmem:[#allocation3_spill] sm:$0xff] %v4689_v20  ;;  %6102 = vst [vmem:[#allocation4_spill] sm:$0xff] %v4698_v23  ;;  %v4709_v26 = vld [vmem:[%s4644_s16 + $0x18] sm:$0xff]   ;;  %v4715_v28 = vld [vmem:[%s4644_s16 + $0x20] sm:$0xff]  }
  0x1c   : > { %705 = vperm.xlu0 %4385, %v664_v11   ;;  %710 = vperm.xlu1 %4386, %v665_v12   ;;  %6103 = vst [vmem:[#allocation5_spill] sm:$0xff] %v4709_v26  ;;  %6104 = vst [vmem:[#allocation6_spill] sm:$0xff] %v4715_v28  ;;  %v4729_v32 = vld [vmem:[%s4644_s16 + $0x28] sm:$0xff]   ;;  %v4735_v34 = vld [vmem:[%s4644_s16 + $0x30] sm:$0xff]  }
  0x1d   : > { %6105 = vst [vmem:[#allocation7_spill] sm:$0xff] %v4729_v32  ;;  %6106 = vst [vmem:[#allocation8_spill] sm:$0xff] %v4735_v34  ;;  %v4749_v38 = vld [vmem:[%s4644_s16 + $0x38] sm:$0xff]   ;;  %v682_v39 = vld [vmem:[%s6026_s1 + $0xb0] sm:$0xf] }
  0x1e   : > { %4079 = vmatpush3.bf16.msra.mxu0 %v4390_v3  ;;  %6107 = vst [vmem:[#allocation9_spill] sm:$0xff] %v4749_v38  ;;  %v4755_v40 = vld [vmem:[%s4644_s16 + $0x40] sm:$0xff]   ;;  %v4760_v41 = vld [vmem:[%s4644_s16 + $0x48] sm:$0xff]   ;;  %v4763_v42 = vld [vmem:[%s4644_s16 + $0x50] sm:$0xff]  }
  0x1f   : > { %4080 = vmatprep.subr.bf16.mxu0 %v4391_v10  ;;  %6108 = vst [vmem:[#allocation10_spill] sm:$0xff] %v4755_v40  ;;  %6109 = vst [vmem:[#allocation11_spill] sm:$0xff] %v4760_v41  ;;  %v4406_v43 = vld [vmem:[%s4644_s16 + $0x58] ss:$0 sps:$4 sm:$0x33]  }
  0x20   : > { %715 = vperm.xlu0 %4385, %v666_v14   ;;  %720 = vperm.xlu1 %4386, %v667_v15   ;;  %6110 = vst [vmem:[#allocation12_spill] sm:$0xff] %v4763_v42  ;;  %v4771_v51 = vld [vmem:[%s6028_s3] ss:$0 sm:$0xff] }
  0x22   : > { %4081 = vmatpush3.bf16.msra.mxu0 %v4391_v10 }
  0x23   : > { %4082 = vmatprep.subr.bf16.mxu0 %v4392_v13 }
  0x24   : > { %725 = vperm.xlu0 %4385, %v668_v17   ;;  %730 = vperm.xlu1 %4386, %v669_v18  }
  0x26   : > { %4083 = vmatpush3.bf16.msra.mxu0 %v4392_v13 }
  0x27   : > { %4084 = vmatprep.subr.bf16.mxu0 %v4393_v16 }
  0x28   : > { %735 = vperm.xlu0 %4385, %v670_v21   ;;  %740 = vperm.xlu1 %4386, %v671_v22  }
  0x2a   : > { %4085 = vmatpush3.bf16.msra.mxu0 %v4393_v16 }
  0x2b   : > { %4086 = vmatprep.subr.bf16.mxu0 %v4394_v19 }
  0x2c   : > { %745 = vperm.xlu0 %4385, %v672_v24   ;;  %750 = vperm.xlu1 %4386, %v673_v25  }
  0x2e   : > { %4087 = vmatpush3.bf16.msra.mxu0 %v4394_v19 }
  0x30   : > { %755 = vperm.xlu0 %4385, %v674_v27   ;;  %760 = vperm.xlu1 %4386, %v675_v29  }
  0x31   : > { %4089 = vmatmul.mubr.bf16.vlgmr.msra.gmra.mrb[0].mxu0 %v4689_v20 }
  0x32   : > { %4092 = vmatprep.mubr.bf16.mxu0 %v4698_v23 }
  0x34   : > { %765 = vperm.xlu0 %4385, %v676_v30   ;;  %770 = vperm.xlu1 %4386, %v677_v31  }
  0x38   : > { %775 = vperm.xlu0 %4385, %v678_v33   ;;  %780 = vperm.xlu1 %4386, %v679_v35  }
  0x39   : > { %4093 = vmatmul.mubr.bf16.gmra.mrb[4].mxu0 %v4709_v26 }
  0x3a   : > { %4096 = vmatprep.mubr.bf16.mxu0 %v4715_v28 }
  0x3c   : > { %785 = vperm.xlu0 %4385, %v680_v36   ;;  %790 = vperm.xlu1 %4386, %v681_v37  }
  0x40   : > { %795 = vperm.xlu0 %4385, %v682_v39  }
  0x41   : > { %4097 = vmatmul.mubr.bf16.gmra.mrb[8].mxu0 %v4729_v32 }
  0x42   : > { %4100 = vmatprep.mubr.bf16.mxu0 %v4735_v34 }
  0x49   : > { %4101 = vmatmul.mubr.bf16.gmra.mrb[12].mxu0 %v4749_v38 }
  0x4a   : > { %4104 = vmatprep.mubr.bf16.mxu0 %v4755_v40 }
  0x51   : > { %4105 = vmatmul.mubr.bf16.gmra.mrb[16].mxu0 %v4760_v41 }
  0x52   : > { %4108 = vmatprep.mubr.bf16.mxu0 %v4763_v42 }
  0x59   : > { %4109 = vmatmul.mubr.bf16.gmra.mrb[20].mxu0 %v4406_v43 }
  0x92   : > { %v686_v44 = vpop.permute.xlu0 %685 }
  0x93   : > { %v696_v45 = vpop.permute.xlu1 %695 }
  0x96   : > { %v691_v46 = vpop.permute.xlu0 %690 }
  0x97   : > { %v701_v47 = vpop.permute.xlu1 %700 }
  0x9b   : > { %v706_v48 = vpop.permute.xlu0 %705  ;;  %v711_v49 = vpop.permute.xlu1 %710 }
  0x9f   : > { %v716_v50 = vpop.permute.xlu0 %715  ;;  %v721_v53 = vpop.permute.xlu1 %720 }
  0xa3   : > { %v726_v56 = vpop.permute.xlu0 %725  ;;  %v731_v2 = vpop.permute.xlu1 %730 }
  0xa7   : > { %v736_v5 = vpop.permute.xlu0 %735  ;;  %v741_v21 = vpop.permute.xlu1 %740 }
  0xab   : > { %v746_v24 = vpop.permute.xlu0 %745 }
 0x104   : > { %v4090_v52 = vpop.f32.mrb[0].mxu0 }
 0x105   : > { %v552_v54 = vadd.f32 %v4090_v52, %v4771_v51  ;;  %v543_v55 = vpop.f32.mrb[1].mxu0 }
 0x106   : > { %v544_v57 = vadd.f32 %v4771_v51, %v543_v55  ;;  %v4091_v58 = vpop.f32.mrb[2].mxu0 }
 0x107   : > { %v639_v59 = vmax.f32 %v552_v54, 0.0  ;;  %v555_v60 = vadd.f32 %v4091_v58, %v4771_v51  ;;  %v546_v61 = vpop.f32.mrb[3].mxu0  ;;  %v756_v54 = vpop.permute.xlu0 %755 }
 0x108   : > { %v637_v62 = vmax.f32 %v544_v57, 0.0  ;;  %v547_v63 = vadd.f32 %v4771_v51, %v546_v61 }
 0x109   : > { %v640_v0 = vmax.f32 %v555_v60, 0.0  ;;  %v800_v3 = vmul.f32 %v696_v45, %v639_v59  ;;  %v751_v45 = vpop.permute.xlu1 %750 }
 0x10a   : > { %v638_v1 = vmax.f32 %v547_v63, 0.0  ;;  %v798_v6 = vmul.f32 %v686_v44, %v637_v62 }
 0x10b   : > { %v801_v4 = vmul.f32 %v701_v47, %v640_v0 }
 0x10c   : > { %v799_v7 = vmul.f32 %v691_v46, %v638_v1  ;;  %v4094_v8 = vpop.f32.mrb[4].mxu0  ;;  %v766_v1 = vpop.permute.xlu0 %765 }
 0x10d   : > { %v822_v9 = vpack.c.bf16 %v801_v4, %v800_v3  ;;  %v568_v10 = vadd.f32 %v4094_v8, %v4771_v51  ;;  %v559_v11 = vpop.f32.mrb[5].mxu0  ;;  %v761_v61 = vpop.permute.xlu1 %760 }
 0x10e   : > { %v821_v12 = vpack.c.bf16 %v799_v7, %v798_v6  ;;  %v560_v13 = vadd.f32 %v4771_v51, %v559_v11  ;;  %v4095_v14 = vpop.f32.mrb[6].mxu0 }
 0x10f   : > { %834 = vst [vmem:[#allocation2 + $0x10] sm:$0xff] %v822_v9  ;;  %v643_v15 = vmax.f32 %v568_v10, 0.0  ;;  %v571_v16 = vadd.f32 %v4095_v14, %v4771_v51  ;;  %v562_v17 = vpop.f32.mrb[7].mxu0 }
 0x110   : > { %833 = vst [vmem:[#allocation2 + $0x8] sm:$0xff] %v821_v12  ;;  %v641_v18 = vmax.f32 %v560_v13, 0.0  ;;  %v563_v19 = vadd.f32 %v4771_v51, %v562_v17  ;;  %v776_v14 = vpop.permute.xlu0 %775 }
 0x111   : > { %v644_v22 = vmax.f32 %v571_v16, 0.0  ;;  %v804_v27 = vmul.f32 %v716_v50, %v643_v15  ;;  %v771_v11 = vpop.permute.xlu1 %770 }
 0x112   : > { %v642_v25 = vmax.f32 %v563_v19, 0.0  ;;  %v802_v30 = vmul.f32 %v706_v48, %v641_v18 }
 0x113   : > { %v805_v29 = vmul.f32 %v721_v53, %v644_v22 }
 0x114   : > { %v803_v31 = vmul.f32 %v711_v49, %v642_v25  ;;  %v4098_v33 = vpop.f32.mrb[8].mxu0 }
 0x115   : > { %v824_v35 = vpack.c.bf16 %v805_v29, %v804_v27  ;;  %v584_v36 = vadd.f32 %v4098_v33, %v4771_v51  ;;  %v575_v37 = vpop.f32.mrb[9].mxu0 }
 0x116   : > { %v823_v39 = vpack.c.bf16 %v803_v31, %v802_v30  ;;  %v576_v43 = vadd.f32 %v4771_v51, %v575_v37  ;;  %v4099_v44 = vpop.f32.mrb[10].mxu0  ;;  %v781_v37 = vpop.permute.xlu1 %780 }
 0x117   : > { %836 = vst [vmem:[#allocation2 + $0x20] sm:$0xff] %v824_v35  ;;  %v647_v46 = vmax.f32 %v584_v36, 0.0  ;;  %v587_v47 = vadd.f32 %v4099_v44, %v4771_v51  ;;  %v578_v52 = vpop.f32.mrb[11].mxu0  ;;  %v786_v36 = vpop.permute.xlu0 %785 }
 0x118   : > { %835 = vst [vmem:[#allocation2 + $0x18] sm:$0xff] %v823_v39  ;;  %v645_v50 = vmax.f32 %v576_v43, 0.0  ;;  %v579_v48 = vadd.f32 %v4771_v51, %v578_v52 }
 0x119   : > { %v648_v49 = vmax.f32 %v587_v47, 0.0  ;;  %v808_v55 = vmul.f32 %v736_v5, %v647_v46 }
 0x11a   : > { %v646_v53 = vmax.f32 %v579_v48, 0.0  ;;  %v806_v58 = vmul.f32 %v726_v56, %v645_v50 }
 0x11b   : > { %v809_v57 = vmul.f32 %v741_v21, %v648_v49 }
 0x11c   : > { %v807_v59 = vmul.f32 %v731_v2, %v646_v53  ;;  %v4102_v60 = vpop.f32.mrb[12].mxu0 }
 0x11d   : > { %v826_v62 = vpack.c.bf16 %v809_v57, %v808_v55  ;;  %v600_v63 = vadd.f32 %v4102_v60, %v4771_v51  ;;  %v591_v0 = vpop.f32.mrb[13].mxu0 }
 0x11e   : > { %v825_v3 = vpack.c.bf16 %v807_v59, %v806_v58  ;;  %v592_v4 = vadd.f32 %v4771_v51, %v591_v0  ;;  %v4103_v6 = vpop.f32.mrb[14].mxu0  ;;  %v796_v58 = vpop.permute.xlu0 %795 }
 0x11f   : > { %838 = vst [vmem:[#allocation2 + $0x30] sm:$0xff] %v826_v62  ;;  %v651_v7 = vmax.f32 %v600_v63, 0.0  ;;  %v603_v8 = vadd.f32 %v4103_v6, %v4771_v51  ;;  %v594_v9 = vpop.f32.mrb[15].mxu0  ;;  %v791_v63 = vpop.permute.xlu1 %790  ;;  %v4540_v6 = vmov (!%p3503_p7), 0  }
 0x120   : > { %837 = vst [vmem:[#allocation2 + $0x28] sm:$0xff] %v825_v3  ;;  %v649_v5 = vmax.f32 %v592_v4, 0.0  ;;  %v595_v56 = vadd.f32 %v4771_v51, %v594_v9  ;;  %849 = vst [vmem:[#allocation2 + $0x8] sm:$0xff] (!%p3503_p7), %v4540_v6 }
 0x121   : > { %v652_v2 = vmax.f32 %v603_v8, 0.0  ;;  %v812_v12 = vmul.f32 %v756_v54, %v651_v7  ;;  %850 = vst [vmem:[#allocation2 + $0x10] sm:$0x1] (!%p3503_p7), %v4540_v6 }
 0x122   : > { %v650_v10 = vmax.f32 %v595_v56, 0.0  ;;  %v810_v15 = vmul.f32 %v746_v24, %v649_v5 }
 0x123   : > { %v813_v13 = vmul.f32 %v761_v61, %v652_v2 }
 0x124   : > { %v811_v16 = vmul.f32 %v751_v45, %v650_v10  ;;  %v4106_v17 = vpop.f32.mrb[16].mxu0 }
 0x125   : > { %v828_v18 = vpack.c.bf16 %v813_v13, %v812_v12  ;;  %v616_v19 = vadd.f32 %v4106_v17, %v4771_v51  ;;  %v607_v21 = vpop.f32.mrb[17].mxu0 }
 0x126   : > { %v827_v22 = vpack.c.bf16 %v811_v16, %v810_v15  ;;  %v608_v25 = vadd.f32 %v4771_v51, %v607_v21  ;;  %v4107_v27 = vpop.f32.mrb[18].mxu0 }
 0x127   : > { %840 = vst [vmem:[#allocation2 + $0x40] sm:$0xff] %v828_v18  ;;  %v655_v29 = vmax.f32 %v616_v19, 0.0  ;;  %v619_v30 = vadd.f32 %v4107_v27, %v4771_v51  ;;  %v610_v31 = vpop.f32.mrb[19].mxu0 }
 0x128   : > { %839 = vst [vmem:[#allocation2 + $0x38] sm:$0xff] %v827_v22  ;;  %v653_v33 = vmax.f32 %v608_v25, 0.0  ;;  %v611_v35 = vadd.f32 %v4771_v51, %v610_v31 }
 0x129   : > { %v656_v24 = vmax.f32 %v619_v30, 0.0  ;;  %v816_v43 = vmul.f32 %v776_v14, %v655_v29 }
 0x12a   : > { %v654_v39 = vmax.f32 %v611_v35, 0.0  ;;  %v814_v45 = vmul.f32 %v766_v1, %v653_v33 }
 0x12b   : > { %v817_v44 = vmul.f32 %v781_v37, %v656_v24 }
 0x12c   : > { %v815_v46 = vmul.f32 %v771_v11, %v654_v39  ;;  %v4110_v47 = vpop.f32.mrb[20].mxu0 }
 0x12d   : > { %v830_v52 = vpack.c.bf16 %v817_v44, %v816_v43  ;;  %v632_v54 = vadd.f32 %v4110_v47, %v4771_v51  ;;  %v623_v50 = vpop.f32.mrb[21].mxu0 }
 0x12e   : > { %v829_v48 = vpack.c.bf16 %v815_v46, %v814_v45  ;;  %v624_v49 = vadd.f32 %v4771_v51, %v623_v50  ;;  %v4111_v53 = vpop.f32.mrb[22].mxu0 }
 0x12f   : > { %842 = vst [vmem:[#allocation2 + $0x50] sm:$0xff] %v830_v52  ;;  %v659_v55 = vmax.f32 %v632_v54, 0.0  ;;  %v626_v57 = vpop.f32.mrb[23].mxu0 }
 0x130   : > { %841 = vst [vmem:[#allocation2 + $0x48] sm:$0xff] %v829_v48  ;;  %v657_v59 = vmax.f32 %v624_v49, 0.0  ;;  %v627_v60 = vadd.f32 %v4771_v51, %v626_v57 }
 0x131   : > { %v820_v61 = vmul.f32 %v796_v58, %v659_v55 }
 0x132   : > { %v658_v62 = vmax.f32 %v627_v60, 0.0  ;;  %v818_v1 = vmul.f32 %v786_v36, %v657_v59  ;;  %848 = sbr.rel (%p3503_p7) target bundleno = 313 (0x139), region = 56 }
 0x133   : > { %v832_v0 = vpack.c.bf16 %v820_v61, %v820_v61 }
 0x134   : > { %v819_v3 = vmul.f32 %v791_v63, %v658_v62 }
 0x135   : > { %844 = vst [vmem:[#allocation2 + $0x60] sm:$0x3] %v832_v0 }
 0x136   : > { %v831_v4 = vpack.c.bf16 %v819_v3, %v818_v1 }
 0x138   : > { %843 = vst [vmem:[#allocation2 + $0x58] sm:$0xff] %v831_v4 }
 0x139 PF: > { %p3504_p8 = scmp.ne.s32.totalorder %s4521_s27, 1 }
 0x13a   : > { %v4541_v51 = vmov (!%p3504_p8), 0  }
 0x13b   : > { %854 = sbr.rel (%p3504_p8) target bundleno = 322 (0x142), region = 60  ;;  %855 = vst [vmem:[#allocation2 + $0x58] sm:$0xfe] (!%p3504_p8), %v4541_v51  ;;  %856 = vst [vmem:[#allocation2 + $0x60] sm:$0x3] (!%p3504_p8), %v4541_v51 }
 0x142 PF: > { %v4417_v7 = vld [vmem:[%s6029_s4 + $0x100] sm:$0xff]   ;;  %v6077_v9 = vmov 0.0   ;;  %vm4543_vm0 = vmmov 0   ;;  %v4420_v56 = vld [vmem:[%s6029_s4 + $0x108] sm:$0xff]   ;;  %v4423_v11 = vld [vmem:[%s6029_s4 + $0x110] sm:$0xff]   ;;  %vm950_vm1 = vcmask 1046528  }
 0x143   : > { %v4418_v8 = vld [vmem:[%s6029_s4 + $0xc0] sm:$0xff]   ;;  %4112 = vmatprep.subr.bf16.mxu0 %v6077_v9  ;;  %3794 = vmatprep.subr.bf16.mxu1 %v4417_v7  ;;  %v4421_v2 = vld [vmem:[%s6029_s4 + $0xc8] sm:$0xff]   ;;  %v4424_v12 = vld [vmem:[%s6029_s4 + $0xd0] sm:$0xff]   ;;  %vm868_vm2 = vsmask.f32 7424  ;;  %v6118_v38 = vmov 0.0  }
 0x144   : > { %v4419_v5 = vld [vmem:[%s6029_s4 + $0x140] sm:$0xff]   ;;  %4128 = vmatprep.mubr.msk.bf16.mxu0 %vm4543_vm0, %v6077_v9  ;;  %3795 = vmatpush3.bf16.msra.mxu1 %v4418_v8  ;;  %v4422_v10 = vld [vmem:[%s6029_s4 + $0x148] sm:$0xff]   ;;  %v4425_v13 = vld [vmem:[%s6029_s4 + $0x150] sm:$0xff]   ;;  %vm1636_vm3 = vsmask.f32 256  ;;  %vm3198_vm5 = vcmask 1045504  }
 0x145   : > { %4113 = vmatpush3.bf16.msra.mxu0 %v4419_v5  ;;  %3796 = vmatprep.subr.bf16.mxu1 %v4420_v56  ;;  %v4426_v14 = vld [vmem:[%s6029_s4 + $0x118] sm:$0xff]   ;;  %v4429_v17 = vld [vmem:[%s6029_s4 + $0x120] sm:$0xff]   ;;  %v4432_v21 = vld [vmem:[%s6029_s4 + $0x128] sm:$0xff]   ;;  %vm2310_vm4 = vsmask.f32 6400 }
 0x146   : > { %4114 = vmatprep.subr.bf16.mxu0 %v6077_v9  ;;  %v4427_v15 = vld [vmem:[%s6029_s4 + $0xd8] sm:$0xff]   ;;  %v4430_v18 = vld [vmem:[%s6029_s4 + $0xe0] sm:$0xff]   ;;  %v4433_v22 = vld [vmem:[%s6029_s4 + $0xe8] sm:$0xff]  }
 0x147   : > { %v4428_v16 = vld [vmem:[%s6029_s4 + $0x158] sm:$0xff]   ;;  %v4431_v19 = vld [vmem:[%s6029_s4 + $0x160] sm:$0xff]   ;;  %v4434_v25 = vld [vmem:[%s6029_s4 + $0x168] sm:$0xff]  }
 0x148   : > { %3797 = vmatpush3.bf16.msra.mxu1 %v4421_v2  ;;  %v4435_v27 = vld [vmem:[%s6029_s4 + $0x130] sm:$0xff]   ;;  %v4438_v31 = vld [vmem:[%s6029_s4 + $0x138] sm:$0xff]   ;;  %v4874_v35 = vld [vmem:[#allocation2 + $0x20] sm:$0xff] }
 0x149   : > { %4115 = vmatpush3.bf16.msra.mxu0 %v4422_v10  ;;  %3798 = vmatprep.subr.bf16.mxu1 %v4423_v11  ;;  %v4436_v29 = vld [vmem:[%s6029_s4 + $0xf0] sm:$0xff]   ;;  %v4872_v33 = vld [vmem:[#allocation2 + $0x18] sm:$0xff]  ;;  %v6045_v43 = vshll.u32 %v4874_v35, 16  ;;  %v4441_v50 = vld [vmem:[%s6029_s4 + $0x40] sm:$0xff]   ;;  %v956_v55 = vrot.slane %v4874_v35, 1  ;;  %v6047_v7 = vshrl.u32 %v4874_v35, 16 }
 0x14a   : > { %4116 = vmatprep.subr.bf16.mxu0 %v6077_v9  ;;  %v4437_v30 = vld [vmem:[%s6029_s4 + $0x170] sm:$0xff]   ;;  %v4439_v36 = vld [vmem:[%s6029_s4 + $0xf8] sm:$0xff]   ;;  %v6054_v37 = vshll.u32 %v4872_v33, 16  ;;  %v6063_v39 = vshrl.u32 %v4872_v33, 16  ;;  %v954_v53 = vrot.slane %v4872_v33, 1  ;;  %v4920_v51 = vld [vmem:[#allocation2 + $0x28] sm:$0xff] }
 0x14b   : > { %v1020_v24 = vld [vmem:[#allocation2 + $0x10] sm:$0xfe]  ;;  %v4440_v46 = vld [vmem:[%s6029_s4 + $0x178] sm:$0xff]   ;;  %v895_v49 = vrot.slane %v6045_v43, 1 }
 0x14c   : > { %3799 = vmatpush3.bf16.msra.mxu1 %v4424_v12  ;;  %v1023_v44 = vshrl.u32 %v1020_v24, 16  ;;  %v4883_v45 = vld [vmem:[#allocation2 + $0x10] sm:$0xff]  ;;  %v1025_v47 = vshll.u32 %v1020_v24, 16  ;;  %v887_v48 = vrot.slane %v6054_v37, 1  ;;  %v1048_v60 = vrot.slane %v1020_v24, 1 }
 0x14d   : > { %4117 = vmatpush3.bf16.msra.mxu0 %v4425_v13  ;;  %3800 = vmatprep.subr.bf16.mxu1 %v4426_v14  ;;  %v6065_v52 = vshll.u32 %v4883_v45, 16  ;;  %v6066_v54 = vrot.slane %v4883_v45, 1  ;;  %v6067_v59 = vshrl.u32 %v4883_v45, 16  ;;  %v4908_v62 = vsel %vm950_vm1, %v954_v53, %v956_v55  ;;  %v4443_v14 = vld [vmem:[%s6029_s4 + $0x80] sm:$0xff]   ;;  %v5112_v37 = vld [vmem:[#allocation2 + $0x58] sm:$0x1] }
 0x14e   : > { %4118 = vmatprep.subr.bf16.mxu0 %v6077_v9  ;;  %v1027_v57 = vrot.slane %v1025_v47, 1  ;;  %v891_v61 = vor.u32 %v6063_v39, %v887_v48  ;;  %v1049_v1 = vsel %vm950_vm1, %v1048_v60, %v954_v53  ;;  %v6052_v3 = vshll.u32 %v4908_v62, 16  ;;  %v4442_v47 = vld [vmem:[%s6029_s4] sm:$0xff]  }
 0x14f   : > { %v4901_v58 = vrot.slane %v6065_v52, 1  ;;  %v4913_v63 = vsel %vm950_vm1, %v6066_v54, %v954_v53  ;;  %v1118_v6 = vshll.u32 %v1049_v1, 16  ;;  %v1116_v56 = vshrl.u32 %v1049_v1, 16 }
 0x150   : > { %3801 = vmatpush3.bf16.msra.mxu1 %v4427_v15  ;;  %v1028_v0 = vor.u32 %v1027_v57, %v1023_v44  ;;  %v4918_v4 = vsel %vm868_vm2, %v891_v61, %v895_v49  ;;  %v1125_v13 = vrot.slane %v6052_v3, 1  ;;  %v899_v15 = vor.u32 %v6047_v7, %v895_v49  ;;  %v4444_v57 = vld [vmem:[%s6029_s4 + $0x48] sm:$0xff]  }
 0x151   : > { %4119 = vmatpush3.bf16.msra.mxu0 %v4428_v16  ;;  %3802 = vmatprep.subr.bf16.mxu1 %v4429_v17  ;;  %v6060_v5 = vshll.u32 %v4918_v4, 16  ;;  %v883_v11 = vor.u32 %v6067_v59, %v4901_v58  ;;  %v1120_v12 = vrot.slane %v1118_v6, 1  ;;  %v6036_v16 = vshll.u32 %v4920_v51, 16  ;;  %v4446_v6 = vld [vmem:[%s6029_s4 + $0x88] sm:$0xff]  }
 0x152   : > { %4120 = vmatprep.subr.bf16.mxu0 %v6077_v9  ;;  %v1029_v8 = vsel %vm868_vm2, %v1028_v0, %v887_v48  ;;  %v4973_v0 = vld [vmem:[#allocation2 + $0x38] sm:$0xff] }
 0x153   : > { %v1104_v2 = vshrl.u32 %v1029_v8, 16  ;;  %v1106_v10 = vshll.u32 %v1029_v8, 16  ;;  %v4948_v24 = vsel %vm868_vm2, %v883_v11, %v887_v48 }
 0x154   : > { %3803 = vmatpush3.bf16.msra.mxu1 %v4430_v18  ;;  %v1113_v18 = vrot.slane %v6060_v5, 1  ;;  %v1039_v5 = vshll.u32 %v5112_v37, 16 }
 0x155   : > { %4121 = vmatpush3.bf16.msra.mxu0 %v4431_v19  ;;  %3804 = vmatprep.subr.bf16.mxu1 %v4432_v21  ;;  %v1108_v17 = vrot.slane %v1106_v10, 1  ;;  %v6064_v19 = vshrl.u32 %v4918_v4, 16  ;;  %v958_v21 = vrot.slane %v4920_v51, 1  ;;  %v4445_v10 = vld [vmem:[%s6029_s4 + $0x8] sm:$0xff]  }
 0x156   : > { %4122 = vmatprep.subr.bf16.mxu0 %v6077_v9  ;;  %v1041_v54 = vrot.slane %v1039_v5, 1 }
 0x157   : > { %v4953_v44 = vsel %vm950_vm1, %v956_v55, %v958_v21 }
 0x158   : > { %3805 = vmatpush3.bf16.msra.mxu1 %v4433_v22  ;;  %v1121_v22 = vor.u32 %v1120_v12, %v1116_v56  ;;  %v6039_v48 = vshll.u32 %v4953_v44, 16 }
 0x159   : > { %4123 = vmatpush3.bf16.msra.mxu0 %v4434_v25  ;;  %3806 = vmatprep.subr.bf16.mxu1 %v4435_v27  ;;  %v903_v25 = vrot.slane %v6036_v16, 1  ;;  %v6062_v27 = vshrl.u32 %v4908_v62, 16  ;;  %v4452_v16 = vld [vmem:[%s6029_s4 + $0x98] sm:$0xff]  }
 0x15a   : > { %4124 = vmatprep.subr.bf16.mxu0 %v6077_v9  ;;  %v1141_v1 = vrot.slane %v6039_v48, 1 }
 0x15b   : > { %v1137_v49 = vor.u32 %v6062_v27, %v1125_v13 }
 0x15c   : > { %3807 = vmatpush3.bf16.msra.mxu1 %v4436_v29  ;;  %v4944_v29 = vld [vmem:[#allocation2 + $0x30] sm:$0xff] }
 0x15d   : > { %4125 = vmatpush3.bf16.msra.mxu0 %v4437_v30  ;;  %3808 = vmatprep.subr.bf16.mxu1 %v4438_v31  ;;  %v6040_v30 = vshrl.u32 %v4920_v51, 16  ;;  %v1109_v31 = vor.u32 %v1108_v17, %v1104_v2  ;;  %v6035_v61 = vshll.u32 %v4944_v29, 16  ;;  %v960_v56 = vrot.slane %v4944_v29, 1 }
 0x15e   : > { %4126 = vmatprep.subr.bf16.mxu0 %v6077_v9  ;;  %v6037_v12 = vshrl.u32 %v4944_v29, 16  ;;  %v6044_v17 = vshrl.u32 %v4953_v44, 16 }
 0x15f   : > { %v1114_v53 = vsel %vm868_vm2, %v1109_v31, %v1113_v18  ;;  %v907_v60 = vor.u32 %v6040_v30, %v903_v25  ;;  %v911_v11 = vrot.slane %v6035_v61, 1 }
 0x160   : > { %3809 = vmatpush3.bf16.msra.mxu1 %v4439_v36  ;;  %v1129_v36 = vor.u32 %v6064_v19, %v1113_v18  ;;  %1458 = vmatprep.mubr.bf16.mxu1 %v1114_v53  ;;  %v4447_v18 = vld [vmem:[%s6029_s4 + $0x50] sm:$0xff]   ;;  %v1153_v30 = vor.u32 %v6044_v17, %v1141_v1 }
 0x161   : > { %4127 = vmatpush3.bf16.msra.mxu0 %v4440_v46  ;;  %3881 = vmatprep.subr.bf16.mxu1 %v4441_v50  ;;  %v1126_v46 = vsel %vm868_vm2, %v1121_v22, %v1125_v13  ;;  %v4960_v50 = vsel %vm868_vm2, %v899_v15, %v903_v25  ;;  %v6034_v13 = vshll.u32 %v4973_v0, 16  ;;  %v4997_v15 = vsel %vm950_vm1, %v958_v21, %v960_v56  ;;  %v4461_v19 = vld [vmem:[%s6029_s4 + $0xb0] sm:$0xff]  }
 0x162   : > { %4164 = vmatprep.subr.bf16.mxu0 %v6077_v9  ;;  %v6046_v55 = vshll.u32 %v4960_v50, 16  ;;  %v6053_v8 = vshrl.u32 %v4960_v50, 16  ;;  %v5005_v25 = vsel %vm868_vm2, %v907_v60, %v911_v11  ;;  %v915_v53 = vor.u32 %v6037_v12, %v911_v11  ;;  %v4448_v60 = vld [vmem:[%s6029_s4 + $0x10] sm:$0xff]  }
 0x163   : > { %1459 = vmatmul.mubr.bf16.vlgmr.msra.gmra.mrb[0].mxu1 %v4948_v24  ;;  %v6038_v21 = vshll.u32 %v5005_v25, 16 }
 0x164   : > { %4129 = vmatmul.mubr.bf16.vlgmr.msra.gmra.mrb[24].mxu0 %v1126_v46  ;;  %v1133_v2 = vrot.slane %v6046_v55, 1  ;;  %3882 = vmatpush3.bf16.msra.mxu1 %v4442_v47  ;;  %v962_v46 = vrot.slane %v4973_v0, 1  ;;  %v5010_v47 = vld [vmem:[#allocation2 + $0x40] sm:$0xff] }
 0x165   : > { %4165 = vmatpush3.bf16.msra.mxu0 %v4443_v14  ;;  %4132 = vmatprep.mubr.msk.bf16.mxu0 %vm4543_vm0, %v6077_v9  ;;  %v1142_v14 = vsel %vm868_vm2, %v1137_v49, %v1141_v1  ;;  %v6043_v49 = vshll.u32 %v4997_v15, 16  ;;  %v6041_v61 = vshll.u32 %v5010_v47, 16 }
 0x166   : > { %4166 = vmatprep.subr.bf16.mxu0 %v6077_v9  ;;  %v1134_v22 = vsel %vm868_vm2, %v1129_v36, %v1133_v2  ;;  %3883 = vmatprep.subr.bf16.mxu1 %v4444_v57  ;;  %v1145_v31 = vor.u32 %v6053_v8, %v1133_v2  ;;  %v4449_v36 = vld [vmem:[%s6029_s4 + $0x90] sm:$0xff]   ;;  %v919_v57 = vrot.slane %v6034_v13, 1  ;;  %v6042_v2 = vshrl.u32 %v4973_v0, 16  ;;  %v4456_v8 = vld [vmem:[%s6029_s4 + $0x68] sm:$0xff]  }
 0x167   : > { %1466 = vmatprep.mubr.bf16.mxu1 %v1134_v22  ;;  %v1149_v22 = vrot.slane %v6038_v21, 1  ;;  %v6051_v13 = vshrl.u32 %v5005_v25, 16 }
 0x168   : > { %3884 = vmatpush3.bf16.msra.mxu1 %v4445_v10  ;;  %v5032_v11 = vsel %vm868_vm2, %v915_v53, %v919_v57  ;;  %v5041_v10 = vsel %vm950_vm1, %v960_v56, %v962_v46  ;;  %v923_v21 = vor.u32 %v6042_v2, %v919_v57  ;;  %v5045_v53 = vld [vmem:[#allocation2 + $0x48] sm:$0xff]  ;;  %v927_v56 = vrot.slane %v6041_v61, 1  ;;  %v4453_v61 = vld [vmem:[%s6029_s4 + $0x60] sm:$0xff]  }
 0x169   : > { %4167 = vmatpush3.bf16.msra.mxu0 %v4446_v6  ;;  %v4450_v6 = vld [vmem:[%s6029_s4 + $0x58] sm:$0xff]   ;;  %3885 = vmatprep.subr.bf16.mxu1 %v4447_v18  ;;  %v6048_v12 = vshll.u32 %v5032_v11, 16  ;;  %v1150_v48 = vsel %vm868_vm2, %v1145_v31, %v1149_v22  ;;  %v6059_v18 = vshrl.u32 %v4997_v15, 16  ;;  %v964_v57 = vrot.slane %v5010_v47, 1 }
 0x16a   : > { %4168 = vmatprep.subr.bf16.mxu0 %v6077_v9  ;;  %v4451_v31 = vld [vmem:[%s6029_s4 + $0x18] sm:$0xff]   ;;  %v6055_v1 = vshll.u32 %v5041_v10, 16  ;;  %v6050_v2 = vshrl.u32 %v5010_v47, 16  ;;  %v1161_v17 = vor.u32 %v6051_v13, %v1149_v22  ;;  %v6056_v43 = vshrl.u32 %v5032_v11, 16  ;;  %v4455_v22 = vld [vmem:[%s6029_s4 + $0xa0] sm:$0xff]  }
 0x16b   : > { %1467 = vmatmul.mubr.bf16.gmra.mrb[4].mxu1 %v4918_v4 }
 0x16c   : > { %4133 = vmatmul.mubr.bf16.gmra.mrb[28].mxu0 %v1142_v14  ;;  %v1157_v14 = vrot.slane %v6043_v49, 1  ;;  %1474 = vmatprep.mubr.bf16.mxu1 %v1150_v48  ;;  %v6049_v49 = vshll.u32 %v5045_v53, 16  ;;  %v1165_v48 = vrot.slane %v6048_v12, 1  ;;  %v931_v55 = vor.u32 %v6050_v2, %v927_v56 }
 0x16d   : > { %4136 = vmatprep.mubr.msk.bf16.mxu0 %vm4543_vm0, %v6077_v9  ;;  %4169 = vmatpush3.bf16.msra.mxu0 %v4449_v36  ;;  %v5065_v36 = vsel %vm868_vm2, %v923_v21, %v927_v56  ;;  %v4454_v56 = vld [vmem:[%s6029_s4 + $0x20] sm:$0xff]   ;;  %v1173_v3 = vrot.slane %v6055_v1, 1  ;;  %v4458_v1 = vld [vmem:[%s6029_s4 + $0xa8] sm:$0xff]  }
 0x16e   : > { %4170 = vmatprep.subr.bf16.mxu0 %v6077_v9  ;;  %3886 = vmatpush3.bf16.msra.mxu1 %v4448_v60  ;;  %v5076_v60 = vld [vmem:[#allocation2 + $0x50] sm:$0xff]  ;;  %v1158_v21 = vsel %vm868_vm2, %v1153_v30, %v1157_v14  ;;  %v935_v7 = vrot.slane %v6049_v49, 1  ;;  %v6058_v12 = vshll.u32 %v5065_v36, 16  ;;  %v5093_v30 = vrot.slane %v5045_v53, 1 }
 0x16f   : > { %3887 = vmatprep.subr.bf16.mxu1 %v4450_v6  ;;  %6111 = vst [vmem:[#allocation13_spill] sm:$0xff] %v5076_v60  ;;  %v5089_v6 = vsel %vm950_vm1, %v962_v46, %v964_v57  ;;  %v6057_v49 = vshrl.u32 %v5045_v53, 16  ;;  %v6061_v2 = vshll.u32 %v5076_v60, 16  ;;  %v1166_v46 = vsel %vm868_vm2, %v1161_v17, %v1165_v48 }
 0x170   : > { %v1169_v13 = vor.u32 %v6059_v18, %v1157_v14  ;;  %v1177_v17 = vor.u32 %v6056_v43, %v1165_v48  ;;  %v6072_v14 = vshrl.u32 %v5041_v10, 16  ;;  %v1181_v48 = vrot.slane %v6058_v12, 1 }
 0x171   : > { %4171 = vmatpush3.bf16.msra.mxu0 %v4452_v16  ;;  %v5139_v43 = vrot.slane %v6061_v2, 1  ;;  %v6076_v12 = vshrl.u32 %v5065_v36, 16 }
 0x172   : > { %4172 = vmatprep.subr.bf16.mxu0 %v6077_v9  ;;  %3888 = vmatpush3.bf16.msra.mxu1 %v4451_v31  ;;  %v5107_v31 = vsel %vm868_vm2, %v931_v55, %v935_v7  ;;  %v4457_v55 = vld [vmem:[%s6029_s4 + $0x28] sm:$0xff]   ;;  %v1174_v2 = vsel %vm868_vm2, %v1169_v13, %v1173_v3  ;;  %v4462_v13 = vld [vmem:[%s6029_s4 + $0x78] sm:$0xff]   ;;  %v1185_v16 = vor.u32 %v6072_v14, %v1173_v3  ;;  %v6114_v3 = vshrl.u32 %v4948_v24, 16 }
 0x173   : > { %3889 = vmatprep.subr.bf16.mxu1 %v4453_v61  ;;  %v5125_v61 = vor.u32 %v6057_v49, %v935_v7  ;;  %1475 = vmatmul.mubr.bf16.gmra.mrb[8].mxu1 %v4960_v50  ;;  %6112 = vst [vmem:[#allocation14_spill] sm:$0xff] %v5139_v43  ;;  %v1050_v7 = vrot.slane %v5076_v60, 1  ;;  %v4459_v49 = vld [vmem:[%s6029_s4 + $0x70] sm:$0xff]   ;;  %v6070_v18 = vshll.u32 %v5107_v31, 16  ;;  %v6116_v14 = vshrl.u32 %v5107_v31, 16 }
 0x174   : > { %4137 = vmatmul.mubr.bf16.gmra.mrb[32].mxu0 %v1158_v21  ;;  %v6068_v21 = vshll.u32 %v5089_v6, 16  ;;  %1482 = vmatprep.mubr.bf16.mxu1 %v1166_v46  ;;  %v1021_v46 = vld [vmem:[#allocation2 + $0x58] sm:$0x3] }
 0x175   : > { %4140 = vmatprep.mubr.msk.bf16.mxu0 %vm4543_vm0, %v6077_v9  ;;  %4173 = vmatpush3.bf16.msra.mxu0 %v4455_v22  ;;  %v5135_v22 = vsel %vm950_vm1, %v964_v57, %v5093_v30  ;;  %v6069_v57 = vshrl.u32 %v5076_v60, 16  ;;  %v5155_v39 = vsel %vm868_vm2, %v5125_v61, %v5139_v43  ;;  %v1197_v5 = vrot.slane %v6070_v18, 1 }
 0x176   : > { %4174 = vmatprep.subr.bf16.mxu0 %v6077_v9  ;;  %3890 = vmatpush3.bf16.msra.mxu1 %v4454_v56  ;;  %v6071_v27 = vshll.u32 %v5135_v22, 16  ;;  %v5159_v56 = vsel %vm950_vm1, %v5093_v30, %v1050_v7  ;;  %v5205_v18 = vrot.slane %v6114_v3, 7  ;;  %v6117_v41 = vshrl.u32 %v5135_v22, 16 }
 0x177   : > { %3891 = vmatprep.subr.bf16.mxu1 %v4456_v8  ;;  %v1189_v8 = vrot.slane %v6068_v21, 1  ;;  %v5170_v52 = vor.u32 %v6069_v57, %v5139_v43  ;;  %v4460_v21 = vld [vmem:[%s6029_s4 + $0x30] sm:$0xff]   ;;  %v1211_v57 = vshll.u32 %v5155_v39, 16  ;;  %v1209_v42 = vor.u32 %v6116_v14, %v1197_v5  ;;  %v4465_v14 = vld [vmem:[%s6029_s4 + $0x1c0] sm:$0xff]  }
 0x178   : > { %v1205_v59 = vrot.slane %v6071_v27, 1  ;;  %v6129_v60 = vshrl.u32 %v4874_v35, 16 }
 0x179   : > { %4175 = vmatpush3.bf16.msra.mxu0 %v4458_v1  ;;  %6113 = vst [vmem:[#allocation15_spill] sm:$0xff] %v5170_v52  ;;  %v1182_v1 = vsel %vm868_vm2, %v1177_v17, %v1181_v48  ;;  %v1219_v17 = vshll.u32 %v5159_v56, 16 }
 0x17a   : > { %4176 = vmatprep.subr.bf16.mxu0 %v6077_v9  ;;  %3892 = vmatpush3.bf16.msra.mxu1 %v4457_v55  ;;  %v1052_v55 = vrot.slane %v1021_v46, 1  ;;  %v5200_v46 = vsel %vm868_vm2, %v5170_v52, %v1041_v54  ;;  %v4463_v54 = vld [vmem:[%s6029_s4 + $0x38] sm:$0xff]  }
 0x17b   : > { %3893 = vmatprep.subr.bf16.mxu1 %v4459_v49  ;;  %1483 = vmatmul.mubr.bf16.gmra.mrb[12].mxu1 %v5005_v25  ;;  %v1193_v49 = vor.u32 %v6076_v12, %v1181_v48  ;;  %v1217_v48 = vor.u32 %v6117_v41, %v1205_v59  ;;  %v5216_v12 = vld [vmem:[#allocation2 + $0x8] sm:$0xff]  ;;  %v1221_v3 = vrot.slane %v1219_v17, 1  ;;  %v1190_v41 = vsel %vm868_vm2, %v1185_v16, %v1189_v8 }
 0x17c   : > { %4141 = vmatmul.mubr.bf16.gmra.mrb[36].mxu0 %v1174_v2  ;;  %v4464_v2 = vld [vmem:[%s6029_s4 + $0xb8] sm:$0xff]   ;;  %1490 = vmatprep.mubr.bf16.mxu1 %v1182_v1  ;;  %v5219_v1 = vsel %vm950_vm1, %v1050_v7, %v1052_v55  ;;  %v1227_v40 = vshll.u32 %v5200_v46, 16  ;;  %v1231_v17 = vshrl.u32 %v5159_v56, 16  ;;  %v6085_v7 = vshll.u32 %v5216_v12, 16 }
 0x17d   : > { %4144 = vmatprep.mubr.msk.bf16.mxu0 %vm4543_vm0, %v6077_v9  ;;  %4177 = vmatpush3.bf16.msra.mxu0 %v4461_v19  ;;  %v6115_v19 = vshrl.u32 %v5089_v6, 16  ;;  %v5234_v34 = vshll.u32 %v1052_v55, 16  ;;  %v6086_v16 = vrot.slane %v5216_v12, 1  ;;  %v1239_v55 = vshrl.u32 %v5200_v46, 16 }
 0x17e   : > { %4178 = vmatprep.subr.bf16.mxu0 %v6077_v9  ;;  %3894 = vmatpush3.bf16.msra.mxu1 %v4460_v21  ;;  %v1213_v9 = vrot.slane %v1211_v57, 1  ;;  %v1223_v21 = vshrl.u32 %v5155_v39, 16  ;;  %v1198_v57 = vsel %vm868_vm2, %v1193_v49, %v1197_v5  ;;  %v5239_v5 = vsel %vm868_vm2, %v1217_v48, %v1221_v3 }
 0x17f   : > { %v1201_v27 = vor.u32 %v6115_v19, %v1189_v8  ;;  %v1043_v19 = vshrl.u32 %v5112_v37, 16  ;;  %3895 = vmatprep.subr.bf16.mxu1 %v4462_v13  ;;  %v1235_v13 = vshll.u32 %v5219_v1, 16  ;;  %v5256_v48 = vor.u32 %v1231_v17, %v1221_v3 }
 0x180   : > { %v1214_v8 = vsel %vm868_vm2, %v1209_v42, %v1213_v9  ;;  %v1683_v3 = vshll.u32 %v4913_v63, 16 }
 0x181   : > { %4179 = vmatpush3.bf16.msra.mxu0 %v4464_v2  ;;  %v1206_v37 = vsel %vm868_vm2, %v1201_v27, %v1205_v59  ;;  %v5241_v56 = vshll.u32 %v1043_v19, 16  ;;  %v6119_v2 = vshrl.u32 %v4883_v45, 16  ;;  %v1225_v59 = vor.u32 %v1223_v21, %v1213_v9 }
 0x182   : > { %4216 = vmatprep.subr.bf16.mxu0 %v6118_v38  ;;  %3896 = vmatpush3.bf16.msra.mxu1 %v4463_v54  ;;  %v1229_v27 = vrot.slane %v1227_v40, 1  ;;  %v6120_v54 = vrot.slane %v4883_v45, 1  ;;  %v6121_v40 = vshll.u32 %v4883_v45, 16  ;;  %v6123_v45 = vshrl.u32 %v4872_v33, 16 }
 0x183   : > { %3968 = vmatprep.subr.bf16.mxu1 %v4465_v14  ;;  %v1668_v49 = vrot.slane %v6119_v2, 7  ;;  %1491 = vmatmul.mubr.bf16.gmra.mrb[16].mxu1 %v5032_v11  ;;  %v5261_v14 = vrot.slane %v6085_v7, 1  ;;  %v1680_v2 = vshrl.u32 %v4913_v63, 16  ;;  %v6122_v7 = vshrl.u32 %v4918_v4, 16 }
 0x184   : > { %4145 = vmatmul.mubr.bf16.gmra.mrb[40].mxu0 %v1190_v41  ;;  %v5253_v42 = vsel %vm950_vm1, %v6086_v16, %v6120_v54  ;;  %1498 = vmatprep.mubr.bf16.mxu1 %v1198_v57  ;;  %v5267_v41 = vrot.slane %v1235_v13, 1  ;;  %v1230_v57 = vsel %vm868_vm2, %v1225_v59, %v1229_v27  ;;  %v6124_v19 = vshrl.u32 %v4908_v62, 16 }
 0x185   : > { %4148 = vmatprep.mubr.msk.bf16.mxu0 %vm4543_vm0, %v6118_v38  ;;  %v5265_v9 = vor.u32 %v1668_v49, %v6121_v40  ;;  %v1661_v21 = vshrl.u32 %v5253_v42, 16  ;;  %v1690_v16 = vrot.slane %v6122_v7, 7  ;;  %v1687_v40 = vrot.slane %v6123_v45, 7 }
 0x186   : > { %v1682_v13 = vrot.slane %v1680_v2, 7  ;;  %v1693_v32 = vrot.slane %v6124_v19, 7  ;;  %v5281_v28 = vor.u32 %v1239_v55, %v1229_v27  ;;  %v6125_v63 = vshll.u32 %v4918_v4, 16 }
 0x187   : > { %v6126_v54 = vshll.u32 %v4872_v33, 16  ;;  %v6127_v7 = vshrl.u32 %v4960_v50, 16  ;;  %v5289_v20 = vrot.slane %v1661_v21, 7  ;;  %v6128_v59 = vshll.u32 %v4908_v62, 16 }
 0x188   : > { %v1691_v17 = vor.u32 %v1690_v16, %v6125_v63  ;;  %v1685_v45 = vor.u32 %v1683_v3, %v1682_v13  ;;  %v1696_v19 = vrot.slane %v6129_v60, 7  ;;  %v6130_v4 = vshrl.u32 %v5216_v12, 16 }
 0x189   : > { %v1688_v26 = vor.u32 %v1687_v40, %v6126_v54  ;;  %v1699_v23 = vrot.slane %v6127_v7, 7  ;;  %v1694_v2 = vor.u32 %v1693_v32, %v6128_v59  ;;  %v6131_v21 = vshll.u32 %v4960_v50, 16 }
 0x18a   : > { %v875_v27 = vor.u32 %v6130_v4, %v5261_v14  ;;  %v5300_v33 = vsel %vm1636_vm3, %v5205_v18, %v1691_v17  ;;  %v5311_v62 = vsel %vm1636_vm3, %v5289_v20, %v1685_v45  ;;  %v6133_v54 = vshrl.u32 %v4953_v44, 16 }
 0x18b   : > { %v5303_v55 = vsel %vm1636_vm3, %v1668_v49, %v1688_v26  ;;  %v1700_v3 = vor.u32 %v1699_v23, %v6131_v21  ;;  %v5314_v60 = vsel %vm1636_vm3, %v1682_v13, %v1694_v2  ;;  %1499 = vmatmul.mubr.bf16.gmra.mrb[20].mxu1 %v5065_v36  ;;  %v6134_v49 = vshrl.u32 %v5005_v25, 16 }
 0x18c   : > { %4149 = vmatmul.mubr.bf16.gmra.mrb[44].mxu0 %v1206_v37  ;;  %v6132_v37 = vshll.u32 %v4874_v35, 16  ;;  %v1702_v26 = vrot.slane %v6133_v54, 7  ;;  %v6135_v7 = vshrl.u32 %v4920_v51, 16  ;;  %v6136_v13 = vshrl.u32 %v4997_v15, 16  ;;  %1506 = vmatprep.mubr.bf16.mxu1 %v1214_v8 }
 0x18d   : > { %4152 = vmatprep.mubr.msk.bf16.mxu0 %vm4543_vm0, %v6118_v38  ;;  %v5322_v50 = vsel %vm1636_vm3, %v1690_v16, %v1700_v3  ;;  %v1708_v63 = vrot.slane %v6134_v49, 7  ;;  %v6137_v2 = vshll.u32 %v4953_v44, 16  ;;  %v6138_v21 = vshrl.u32 %v5032_v11, 16 }
 0x18e   : > { %v1697_v17 = vor.u32 %v1696_v19, %v6132_v37  ;;  %v1705_v45 = vrot.slane %v6135_v7, 7  ;;  %v1711_v59 = vrot.slane %v6136_v13, 7  ;;  %v6139_v3 = vshrl.u32 %v4944_v29, 16 }
 0x18f   : > { %v1703_v4 = vor.u32 %v1702_v26, %v6137_v2  ;;  %v1717_v16 = vrot.slane %v6138_v21, 7  ;;  %v6140_v54 = vshll.u32 %v5005_v25, 16  ;;  %v6141_v7 = vshll.u32 %v4920_v51, 16 }
 0x190   : > { %v5331_v35 = vsel %vm1636_vm3, %v1687_v40, %v1697_v17  ;;  %v1714_v37 = vrot.slane %v6139_v3, 7  ;;  %v6142_v8 = vshll.u32 %v4997_v15, 16  ;;  %v6143_v40 = vshrl.u32 %v5041_v10, 16 }
 0x191   : > { %v1709_v49 = vor.u32 %v1708_v63, %v6140_v54  ;;  %v1706_v52 = vor.u32 %v1705_v45, %v6141_v7  ;;  %v5348_v44 = vsel %vm1636_vm3, %v1693_v32, %v1703_v4  ;;  %v6144_v2 = vshll.u32 %v5032_v11, 16 }
 0x192   : > { %v1712_v13 = vor.u32 %v1711_v59, %v6142_v8  ;;  %v1720_v17 = vrot.slane %v6143_v40, 7  ;;  %v6145_v3 = vshll.u32 %v4944_v29, 16  ;;  %v6146_v25 = vshrl.u32 %v5065_v36, 16 }
 0x193   : > { %v1718_v21 = vor.u32 %v1717_v16, %v6144_v2  ;;  %v5357_v51 = vsel %vm1636_vm3, %v1699_v23, %v1709_v49  ;;  %v5360_v15 = vsel %vm1636_vm3, %v1696_v19, %v1706_v52  ;;  %v6147_v32 = vshll.u32 %v5041_v10, 16  ;;  %1507 = vmatmul.mubr.bf16.gmra.mrb[24].mxu1 %v5107_v31 }
 0x194   : > { %v1715_v43 = vor.u32 %v1714_v37, %v6145_v3  ;;  %v1726_v54 = vrot.slane %v6146_v25, 7  ;;  %v5363_v7 = vsel %vm1636_vm3, %v1702_v26, %v1712_v13  ;;  %v6148_v8 = vshll.u32 %v5065_v36, 16  ;;  %4153 = vmatmul.mubr.bf16.gmra.mrb[48].mxu0 %v5239_v5  ;;  %1514 = vmatprep.mubr.bf16.mxu1 %v1230_v57 }
 0x195   : > { %v1721_v4 = vor.u32 %v1720_v17, %v6147_v32  ;;  %v5368_v11 = vsel %vm1636_vm3, %v1708_v63, %v1718_v21  ;;  %v6149_v23 = vshrl.u32 %v4973_v0, 16  ;;  %v880_v52 = vsel %vm868_vm2, %v875_v27, %v4901_v58  ;;  %4156 = vmatprep.mubr.msk.bf16.mxu0 %vm4543_vm0, %v6118_v38 }
 0x196   : > { %v5371_v29 = vsel %vm1636_vm3, %v1705_v45, %v1715_v43  ;;  %v1727_v40 = vor.u32 %v1726_v54, %v6148_v8  ;;  %v6150_v19 = vshrl.u32 %v5089_v6, 16  ;;  %v6151_v43 = vshrl.u32 %v5107_v31, 16 }
 0x197   : > { %v1723_v49 = vrot.slane %v6149_v23, 7  ;;  %v5381_v10 = vsel %vm1636_vm3, %v1711_v59, %v1721_v4  ;;  %v6152_v5 = vshll.u32 %v4973_v0, 16  ;;  %v6153_v58 = vshrl.u32 %v5010_v47, 16 }
 0x198   : > { %v1729_v26 = vrot.slane %v6150_v19, 7  ;;  %v1735_v63 = vrot.slane %v6151_v43, 7  ;;  %v5390_v36 = vsel %vm1636_vm3, %v1717_v16, %v1727_v40  ;;  %v6154_v59 = vshrl.u32 %v5135_v22, 16 }
 0x199   : > { %v1724_v45 = vor.u32 %v1723_v49, %v6152_v5  ;;  %v1732_v27 = vrot.slane %v6153_v58, 7  ;;  %v6155_v2 = vshll.u32 %v5089_v6, 16  ;;  %v6156_v3 = vshll.u32 %v5107_v31, 16  ;;  %v867_v58 = vld [vmem:[#allocation2 + $0x50] sm:$0x1] }
 0x19a   : > { %v1738_v13 = vrot.slane %v6154_v59, 7  ;;  %v1745_v16 = vshrl.u32 %v5125_v61, 16  ;;  %v1748_v32 = vshll.u32 %v5125_v61, 16  ;;  %v6157_v4 = vshll.u32 %v5010_v47, 16 }
 0x19b   : > { %v1730_v21 = vor.u32 %v1729_v26, %v6155_v2  ;;  %v1736_v25 = vor.u32 %v1735_v63, %v6156_v3  ;;  %v5406_v0 = vsel %vm1636_vm3, %v1714_v37, %v1724_v45  ;;  %v6158_v40 = vshll.u32 %v5135_v22, 16  ;;  %1515 = vmatmul.mubr.bf16.gmra.mrb[28].mxu1 %v5155_v39 }
 0x19c   : > { %v1733_v8 = vor.u32 %v1732_v27, %v6157_v4  ;;  %v6159_v6 = vshrl.u32 %v5045_v53, 16  ;;  %v1649_v43 = vshrl.u32 %v880_v52, 16  ;;  %v1747_v61 = vrot.slane %v1745_v16, 7 }
 0x19d   : > { %v1739_v23 = vor.u32 %v1738_v13, %v6158_v40  ;;  %v5415_v31 = vsel %vm1636_vm3, %v1720_v17, %v1730_v21  ;;  %v5418_v5 = vsel %vm1636_vm3, %v1726_v54, %v1736_v25  ;;  %v1238_v57 = vsel %vm868_vm2, %v5256_v48, %v5267_v41 }
 0x19e   : > { %v1741_v19 = vrot.slane %v6159_v6, 7  ;;  %v5424_v47 = vsel %vm1636_vm3, %v1723_v49, %v1733_v8  ;;  %v6160_v37 = vshll.u32 %v5045_v53, 16  ;;  %v1750_v17 = vor.u32 %v1748_v32, %v1747_v61  ;;  %4157 = vmatmul.mubr.bf16.gmra.mrb[52].mxu0 %v1238_v57  ;;  %v857_v32 = vld [vmem:[#allocation2] sm:$0x80] }
 0x19f   : > { %v5427_v22 = vsel %vm1636_vm3, %v1729_v26, %v1739_v23  ;;  %v968_v59 = vrot.slane %v867_v58, 1  ;;  %v6161_v54 = vrot.slane %v5241_v56, 1  ;;  %v1645_v21 = vshrl.u32 %v5261_v14, 16  ;;  %4160 = vmatprep.mubr.msk.bf16.mxu0 %vm4543_vm0, %v6118_v38 }
 0x1a0   : > { %v1742_v45 = vor.u32 %v1741_v19, %v6160_v37  ;;  %v1651_v49 = vrot.slane %v1649_v43, 7  ;;  %v1652_v26 = vshll.u32 %v880_v52, 16  ;;  %v5440_v3 = vsel %vm1636_vm3, %v1735_v63, %v1750_v17  ;;  %v4469_v17 = vld [vmem:[%s6029_s4 + $0x188] sm:$0xff]  }
 0x1a1   : > { %v1246_v2 = vsel %vm868_vm2, %v5281_v28, %v6161_v54  ;;  %v969_v53 = vsel %vm950_vm1, %v5093_v30, %v968_v59  ;;  %v6162_v28 = vshrl.u32 %v5219_v1, 16  ;;  %v1253_v14 = vrot.slane %v5234_v34, 1  ;;  %v4471_v59 = vld [vmem:[%s6029_s4 + $0x1d0] sm:$0xff]  }
 0x1a2   : > { %v5437_v48 = vsel %vm1636_vm3, %v1732_v27, %v1742_v45  ;;  %v1753_v27 = vshrl.u32 %v969_v53, 16  ;;  %v1756_v25 = vshll.u32 %v969_v53, 16  ;;  %1522 = vmatprep.mubr.bf16.mxu1 %v1246_v2  ;;  %v1647_v63 = vrot.slane %v1645_v21, 7  ;;  %v4467_v45 = vld [vmem:[%s6029_s4 + $0x200] sm:$0xff]   ;;  %v4473_v54 = vld [vmem:[%s6029_s4 + $0x210] sm:$0xff]  }
 0x1a3   : > { %v1249_v56 = vor.u32 %v6162_v28, %v5267_v41  ;;  %v1654_v16 = vor.u32 %v1652_v26, %v1651_v49  ;;  %v6163_v30 = vrot.slane %v5216_v12, 1  ;;  %v1664_v8 = vshll.u32 %v5253_v42, 16  ;;  %1523 = vmatmul.mubr.bf16.gmra.mrb[32].mxu1 %v5200_v46  ;;  %v4472_v21 = vld [vmem:[%s6029_s4 + $0x190] sm:$0xff]   ;;  %v4477_v26 = vld [vmem:[%s6029_s4 + $0x1e0] sm:$0xff]   ;;  %v4480_v28 = vld [vmem:[%s6029_s4 + $0x1e8] sm:$0xff]  }
 0x1a4   : > { %v1755_v52 = vrot.slane %v1753_v27, 7  ;;  %v1638_v41 = vshrl.u32 %v857_v32, 16  ;;  %v6164_v34 = vshrl.u32 %v5216_v12, 16  ;;  %v1675_v39 = vshll.u32 %v4948_v24, 16  ;;  %v4479_v53 = vld [vmem:[%s6029_s4 + $0x220] sm:$0xff]   ;;  %v4485_v27 = vld [vmem:[%s6029_s4 + $0x230] sm:$0xff]  }
 0x1a5   : > { %v1657_v4 = vshrl.u32 %v6163_v30, 16  ;;  %v1254_v40 = vsel %vm868_vm2, %v1249_v56, %v1253_v14  ;;  %v1655_v19 = vsel %vm1636_vm3, %v1647_v63, %v1654_v16  ;;  %v1666_v42 = vor.u32 %v1664_v8, %v5289_v20  ;;  %v4466_v20 = vld [vmem:[%s6029_s4 + $0x180] sm:$0xff]   ;;  %v4482_v56 = vld [vmem:[%s6029_s4 + $0x228] sm:$0xff]   ;;  %v4483_v14 = vld [vmem:[%s6029_s4 + $0x1f0] sm:$0xff]  }
 0x1a6   : > { %v1758_v1 = vor.u32 %v1756_v25, %v1755_v52  ;;  %v1641_v23 = vrot.slane %v6164_v34, 7  ;;  %4161 = vmatmul.mubr.bf16.gmra.mrb[56].mxu0 %v1254_v40  ;;  %1963 = vmatprep.mubr.bf16.mxu1 %v1655_v19  ;;  %v1640_v61 = vrot.slane %v1638_v41, 7  ;;  %v6165_v57 = vshll.u32 %v5216_v12, 16  ;;  %v4468_v12 = vld [vmem:[%s6029_s4 + $0x1c8] sm:$0xff]   ;;  %v4488_v25 = vld [vmem:[%s6029_s4 + $0x238] sm:$0xff]   ;;  %v5568_v52 = vld [vmem:[#allocation2 + $0x20] sm:$0xff] }
 0x1a7   : > { %4180 = vmatprep.mubr.msk.bf16.mxu0 %vm4543_vm0, %v6118_v38  ;;  %v1659_v43 = vrot.slane %v1657_v4, 7  ;;  %v2151_v63 = vld [vmem:[#allocation2 + $0x18] sm:$0xfc]  ;;  %v5576_v16 = vld [vmem:[#allocation2 + $0x28] sm:$0xff]  ;;  %v2165_v8 = vshrl.u32 %v5568_v52, 16 }
 0x1a8   : > { %v5458_v6 = vsel %vm1636_vm3, %v1738_v13, %v1758_v1  ;;  %v1642_v37 = vor.u32 %v1641_v23, %v6165_v57  ;;  %v1677_v13 = vor.u32 %v1675_v39, %v5205_v18  ;;  %v4470_v18 = vld [vmem:[%s6029_s4 + $0x208] sm:$0xff]   ;;  %v1670_v2 = vsel %vm1636_vm3, %v1641_v23, %v5265_v9  ;;  %v4476_v9 = vld [vmem:[%s6029_s4 + $0x218] sm:$0xff]   ;;  %v5589_v1 = vld [vmem:[#allocation2 + $0x30] sm:$0xff] }
 0x1a9   : > { %v1667_v24 = vsel %vm1636_vm3, %v1659_v43, %v1666_v42  ;;  %v2169_v32 = vshll.u32 %v5576_v16, 16  ;;  %v2243_v23 = vrot.slane %v5568_v52, 1  ;;  %v2177_v39 = vshll.u32 %v5589_v1, 16 }
 0x1aa   : > { %v1643_v58 = vsel %vm1636_vm3, %v1640_v61, %v1642_v37  ;;  %v1678_v46 = vsel %vm1636_vm3, %v1651_v49, %v1677_v13  ;;  %v4474_v49 = vld [vmem:[%s6029_s4 + $0x1d8] sm:$0xff]  }
 0x1ab   : > { %1964 = vmatmul.mubr.bf16.vlgmr.msra.gmra.mrb[36].mxu1 %v1643_v58  ;;  %v2171_v40 = vrot.slane %v2169_v32, 1  ;;  %v2179_v13 = vrot.slane %v2177_v39, 1 }
 0x1ac   : > { %3969 = vmatpush3.bf16.msra.mxu1 %v4466_v20  ;;  %1971 = vmatprep.mubr.bf16.mxu1 %v1678_v46  ;;  %v5608_v20 = vld [vmem:[#allocation2 + $0x38] sm:$0xff] }
 0x1ad   : > { %3970 = vmatprep.subr.bf16.mxu1 %v4468_v12  ;;  %v2141_v46 = vld [vmem:[#allocation2 + $0x18] sm:$0xfe] }
 0x1ae   : > { %4181 = vmatmul.mubr.bf16.vlgmr.msra.gmra.mrb[60].mxu0 %v1667_v24 }
 0x1af   : > { %4217 = vmatpush3.bf16.msra.mxu0 %v4467_v45  ;;  %4184 = vmatprep.mubr.msk.bf16.mxu0 %vm4543_vm0, %v6118_v38 }
 0x1b0   : > { %4218 = vmatprep.subr.bf16.mxu0 %v6118_v38  ;;  %3971 = vmatpush3.bf16.msra.mxu1 %v4469_v17 }
 0x1b1   : > { %3972 = vmatprep.subr.bf16.mxu1 %v4471_v59 }
 0x1b3   : > { %4219 = vmatpush3.bf16.msra.mxu0 %v4470_v18  ;;  %1972 = vmatmul.mubr.bf16.gmra.mrb[40].mxu1 %v1670_v2  ;;  %v2181_v2 = vshrl.u32 %v5589_v1, 16 }
 0x1b4   : > { %4220 = vmatprep.subr.bf16.mxu0 %v6118_v38  ;;  %1979 = vmatprep.mubr.bf16.mxu1 %v5300_v33  ;;  %v4478_v33 = vld [vmem:[%s6029_s4 + $0x1a0] sm:$0xff]  }
 0x1b5   : > { %3973 = vmatpush3.bf16.msra.mxu1 %v4472_v21  ;;  %v2185_v21 = vshll.u32 %v5608_v20, 16 }
 0x1b6   : > { %4185 = vmatmul.mubr.bf16.gmra.mrb[64].mxu0 %v5311_v62  ;;  %v4475_v62 = vld [vmem:[%s6029_s4 + $0x198] sm:$0xff]   ;;  %3974 = vmatprep.subr.bf16.mxu1 %v4474_v49 }
 0x1b7   : > { %4188 = vmatprep.mubr.msk.bf16.mxu0 %vm4543_vm0, %v6118_v38  ;;  %4221 = vmatpush3.bf16.msra.mxu0 %v4473_v54  ;;  %v2247_v54 = vrot.slane %v5589_v1, 1 }
 0x1b8   : > { %4222 = vmatprep.subr.bf16.mxu0 %v6118_v38 }
 0x1b9   : > { %3975 = vmatpush3.bf16.msra.mxu1 %v4475_v62  ;;  %v2312_v62 = vshrl.u32 %v2141_v46, 16 }
 0x1ba   : > { %3976 = vmatprep.subr.bf16.mxu1 %v4477_v26  ;;  %v2315_v26 = vshll.u32 %v2141_v46, 16 }
 0x1bb   : > { %4223 = vmatpush3.bf16.msra.mxu0 %v4476_v9  ;;  %1980 = vmatmul.mubr.bf16.gmra.mrb[44].mxu1 %v5303_v55  ;;  %v4484_v55 = vld [vmem:[%s6029_s4 + $0x1b0] sm:$0xff]  }
 0x1bc   : > { %4224 = vmatprep.subr.bf16.mxu0 %v6118_v38  ;;  %1987 = vmatprep.mubr.bf16.mxu1 %v5322_v50  ;;  %v4486_v50 = vld [vmem:[%s6029_s4 + $0x1f8] sm:$0xff]  }
 0x1bd   : > { %3977 = vmatpush3.bf16.msra.mxu1 %v4478_v33 }
 0x1be   : > { %4189 = vmatmul.mubr.bf16.gmra.mrb[68].mxu0 %v5314_v60  ;;  %v4481_v60 = vld [vmem:[%s6029_s4 + $0x1a8] sm:$0xff]   ;;  %3978 = vmatprep.subr.bf16.mxu1 %v4480_v28 }
 0x1bf   : > { %4192 = vmatprep.mubr.msk.bf16.mxu0 %vm4543_vm0, %v6118_v38  ;;  %4225 = vmatpush3.bf16.msra.mxu0 %v4479_v53 }
 0x1c0   : > { %4226 = vmatprep.subr.bf16.mxu0 %v6118_v38 }
 0x1c1   : > { %3979 = vmatpush3.bf16.msra.mxu1 %v4481_v60 }
 0x1c2   : > { %3980 = vmatprep.subr.bf16.mxu1 %v4483_v14 }
 0x1c3   : > { %4227 = vmatpush3.bf16.msra.mxu0 %v4482_v56  ;;  %1988 = vmatmul.mubr.bf16.gmra.mrb[48].mxu1 %v5331_v35  ;;  %v2156_v35 = vshll.u32 %v2151_v63, 16 }
 0x1c4   : > { %4228 = vmatprep.subr.bf16.mxu0 %v6118_v38  ;;  %1995 = vmatprep.mubr.bf16.mxu1 %v5357_v51  ;;  %v2161_v51 = vshll.u32 %v5568_v52, 16 }
 0x1c5   : > { %3981 = vmatpush3.bf16.msra.mxu1 %v4484_v55  ;;  %v2158_v30 = vrot.slane %v2156_v35, 1  ;;  %v2314_v55 = vrot.slane %v2312_v62, 1 }
 0x1c6   : > { %4193 = vmatmul.mubr.bf16.gmra.mrb[72].mxu0 %v5348_v44  ;;  %v4487_v44 = vld [vmem:[%s6029_s4 + $0x1b8] sm:$0xff]   ;;  %3982 = vmatprep.subr.bf16.mxu1 %v4486_v50  ;;  %v2163_v4 = vrot.slane %v2161_v51, 1  ;;  %v2317_v50 = vrot.slane %v2315_v26, 2 }
 0x1c7   : > { %4196 = vmatprep.mubr.msk.bf16.mxu0 %vm4543_vm0, %v6118_v38  ;;  %4229 = vmatpush3.bf16.msra.mxu0 %v4485_v27  ;;  %v2183_v27 = vor.u32 %v2181_v2, %v2179_v13 }
 0x1c8   : > { %4230 = vmatprep.subr.bf16.mxu0 %v6118_v38 }
 0x1c9   : > { %3983 = vmatpush3.bf16.msra.mxu1 %v4487_v44  ;;  %v5626_v44 = vld [vmem:[#allocation2 + $0x40] sm:$0xff] }
 0x1ca   : > { %4320 = vmatprep.subr.bf16.mxu1 %v6118_v38 }
 0x1cb   : > { %4231 = vmatpush3.bf16.msra.mxu0 %v4488_v25  ;;  %1996 = vmatmul.mubr.bf16.gmra.mrb[52].mxu1 %v5360_v15  ;;  %v2319_v25 = vrot.slane %v2165_v8, 1 }
 0x1cc   : > { %4268 = vmatprep.subr.bf16.mxu0 %v6118_v38  ;;  %2003 = vmatprep.mubr.bf16.mxu1 %v5368_v11  ;;  %v2167_v11 = vor.u32 %v2165_v8, %v2163_v4 }
 0x1ce   : > { %4197 = vmatmul.mubr.bf16.gmra.mrb[76].mxu0 %v5363_v7  ;;  %v2154_v7 = vshrl.u32 %v2151_v63, 16  ;;  %v2172_v34 = vsel %vm868_vm2, %v2167_v11, %v2171_v40  ;;  %v2249_v11 = vrot.slane %v5608_v20, 1 }
 0x1cf   : > { %4200 = vmatprep.mubr.msk.bf16.mxu0 %vm4543_vm0, %v6118_v38  ;;  %v2332_v42 = vshrl.u32 %v2172_v34, 16  ;;  %v2335_v61 = vshll.u32 %v2172_v34, 16 }
 0x1d0   : > { %v2159_v15 = vor.u32 %v2158_v30, %v2154_v7 }
 0x1d1   : > { %v2334_v58 = vrot.slane %v2332_v42, 1 }
 0x1d2   : > { %v2164_v41 = vsel %vm868_vm2, %v2159_v15, %v2163_v4 }
 0x1d3   : > { %2004 = vmatmul.mubr.bf16.gmra.mrb[56].mxu1 %v5371_v29  ;;  %v2245_v29 = vrot.slane %v5576_v16, 1  ;;  %v2324_v19 = vshrl.u32 %v2164_v41, 16  ;;  %v2327_v43 = vshll.u32 %v2164_v41, 16  ;;  %v2318_v41 = vor.u32 %v2317_v50, %v2314_v55 }
 0x1d4   : > { %2011 = vmatprep.mubr.bf16.mxu1 %v5390_v36  ;;  %v2173_v36 = vshrl.u32 %v5576_v16, 16  ;;  %v2251_v16 = vrot.slane %v5626_v44, 1 }
 0x1d5   : > { %v2246_v57 = vsel %vm950_vm1, %v2243_v23, %v2245_v29  ;;  %v2326_v24 = vrot.slane %v2324_v19, 1  ;;  %v2329_v45 = vrot.slane %v2327_v43, 2  ;;  %v2248_v14 = vsel %vm950_vm1, %v2245_v29, %v2247_v54 }
 0x1d6   : > { %4201 = vmatmul.mubr.bf16.gmra.mrb[80].mxu0 %v5381_v10  ;;  %v2242_v10 = vrot.slane %v2151_v63, 1  ;;  %v2175_v37 = vor.u32 %v2173_v36, %v2171_v40  ;;  %v2352_v17 = vshll.u32 %v2246_v57, 16  ;;  %v2371_v15 = vshrl.u32 %v2248_v14, 16 }
 0x1d7   : > { %4204 = vmatprep.mubr.msk.bf16.mxu0 %vm4543_vm0, %v6118_v38  ;;  %v2330_v49 = vor.u32 %v2329_v45, %v2326_v24  ;;  %v2374_v8 = vshll.u32 %v2248_v14, 16  ;;  %v2193_v40 = vshll.u32 %v5626_v44, 16  ;;  %v2250_v19 = vsel %vm950_vm1, %v2247_v54, %v2249_v11 }
 0x1d8   : > { %v2180_v59 = vsel %vm868_vm2, %v2175_v37, %v2179_v13  ;;  %v2354_v28 = vrot.slane %v2352_v17, 2  ;;  %v2373_v43 = vrot.slane %v2371_v15, 1  ;;  %v2357_v37 = vrot.slane %v2173_v36, 1 }
 0x1d9   : > { %v2362_v56 = vshrl.u32 %v2180_v59, 16  ;;  %v2365_v60 = vshll.u32 %v2180_v59, 16  ;;  %v2376_v42 = vrot.slane %v2374_v8, 2  ;;  %v2358_v13 = vrot.slane %v2169_v32, 2 }
 0x1da   : > { %v2393_v24 = vshrl.u32 %v2250_v19, 16  ;;  %v2396_v45 = vshll.u32 %v2250_v19, 16 }
 0x1db   : > { %2012 = vmatmul.mubr.bf16.gmra.mrb[60].mxu1 %v5406_v0  ;;  %v2337_v0 = vrot.slane %v2335_v61, 2  ;;  %v2364_v30 = vrot.slane %v2362_v56, 1  ;;  %v2367_v4 = vrot.slane %v2365_v60, 2  ;;  %v2359_v32 = vor.u32 %v2358_v13, %v2357_v37 }
 0x1dc   : > { %2019 = vmatprep.mubr.bf16.mxu1 %v5418_v5  ;;  %v2349_v5 = vshrl.u32 %v2246_v57, 16  ;;  %v5644_v57 = vld [vmem:[#allocation2 + $0x48] sm:$0xff]  ;;  %v2395_v17 = vrot.slane %v2393_v24, 1  ;;  %v2398_v59 = vrot.slane %v2396_v45, 2 }
 0x1dd   : > { %v2338_v9 = vor.u32 %v2337_v0, %v2334_v58  ;;  %v2201_v36 = vshll.u32 %v5644_v57, 16  ;;  %v2253_v55 = vrot.slane %v5644_v57, 1 }
 0x1de   : > { %4205 = vmatmul.mubr.bf16.gmra.mrb[84].mxu0 %v5415_v31  ;;  %v2244_v31 = vsel %vm950_vm1, %v2242_v10, %v2243_v23  ;;  %v2351_v33 = vrot.slane %v2349_v5, 1  ;;  %v2368_v10 = vor.u32 %v2367_v4, %v2364_v30  ;;  %v2197_v5 = vshrl.u32 %v5626_v44, 16 }
 0x1df   : > { %4208 = vmatprep.mubr.msk.bf16.mxu0 %vm4543_vm0, %v6118_v38  ;;  %v2341_v12 = vshrl.u32 %v2244_v31, 16  ;;  %v2344_v18 = vshll.u32 %v2244_v31, 16  ;;  %v2339_v63 = vsel %vm2310_vm4, %v2330_v49, %v2338_v9  ;;  %v2195_v31 = vrot.slane %v2193_v40, 1 }
 0x1e0   : > { %v2355_v7 = vor.u32 %v2354_v28, %v2351_v33  ;;  %v2369_v58 = vsel %vm2310_vm4, %v2338_v9, %v2368_v10  ;;  %v2380_v33 = vrot.slane %v2177_v39, 2  ;;  %v2252_v28 = vsel %vm950_vm1, %v2249_v11, %v2251_v16 }
 0x1e1   : > { %v2346_v53 = vrot.slane %v2344_v18, 2  ;;  %v2199_v26 = vor.u32 %v2197_v5, %v2195_v31  ;;  %v2399_v60 = vor.u32 %v2398_v59, %v2395_v17  ;;  %v2415_v50 = vshrl.u32 %v2252_v28, 16 }
 0x1e2   : > { %v2205_v39 = vshrl.u32 %v5644_v57, 16 }
 0x1e3   : > { %2020 = vmatmul.mubr.bf16.gmra.mrb[64].mxu1 %v5424_v47  ;;  %v2187_v47 = vrot.slane %v2185_v21, 1  ;;  %v2417_v4 = vrot.slane %v2415_v50, 1 }
 0x1e4   : > { %2027 = vmatprep.mubr.bf16.mxu1 %v5440_v3  ;;  %v2320_v3 = vrot.slane %v2161_v51, 2  ;;  %v2189_v51 = vshrl.u32 %v5608_v20, 16 }
 0x1e5   : > { %v2188_v52 = vsel %vm868_vm2, %v2183_v27, %v2187_v47 }
 0x1e6   : > { %4209 = vmatmul.mubr.bf16.gmra.mrb[88].mxu0 %v5427_v22  ;;  %v2343_v22 = vrot.slane %v2341_v12, 1  ;;  %v2321_v34 = vor.u32 %v2320_v3, %v2319_v25  ;;  %v2384_v23 = vshrl.u32 %v2188_v52, 16  ;;  %v2387_v29 = vshll.u32 %v2188_v52, 16  ;;  %v5679_v52 = vld [vmem:[#allocation2 + $0x58] sm:$0xff] }
 0x1e7   : > { %4212 = vmatprep.mubr.msk.bf16.mxu0 %vm4543_vm0, %v6118_v38  ;;  %v2191_v61 = vor.u32 %v2189_v51, %v2187_v47  ;;  %v2377_v12 = vor.u32 %v2376_v42, %v2373_v43  ;;  %v6166_v42 = vld [vmem:[#allocation14_spill] sm:$0xff]  ;;  %v2257_v44 = vrot.slane %v5679_v52, 1 }
 0x1e8   : > { %v2347_v35 = vor.u32 %v2346_v53, %v2343_v22  ;;  %v2386_v0 = vrot.slane %v2384_v23, 1  ;;  %v2389_v46 = vrot.slane %v2387_v29, 2  ;;  %v2203_v22 = vrot.slane %v2201_v36, 1 }
 0x1e9   : > { %v2196_v18 = vsel %vm868_vm2, %v2191_v61, %v2195_v31  ;;  %v2378_v62 = vsel %vm2310_vm4, %v2355_v7, %v2377_v12  ;;  %v2379_v53 = vrot.slane %v2181_v2, 1  ;;  %v2360_v56 = vsel %vm2310_vm4, %v2321_v34, %v2359_v32  ;;  %v4498_v31 = vld [vmem:[#allocation2 + $0x50] sm:$0xff] }
 0x1ea   : > { %v2390_v54 = vor.u32 %v2389_v46, %v2386_v0  ;;  %v2406_v49 = vshrl.u32 %v2196_v18, 16  ;;  %v2409_v9 = vshll.u32 %v2196_v18, 16  ;;  %v2418_v2 = vshll.u32 %v2252_v28, 16 }
 0x1eb   : > { %2028 = vmatmul.mubr.bf16.gmra.mrb[68].mxu1 %v5437_v48  ;;  %v2322_v48 = vsel %vm2310_vm4, %v2318_v41, %v2321_v34  ;;  %v2204_v1 = vsel %vm868_vm2, %v2199_v26, %v2203_v22  ;;  %v2381_v25 = vor.u32 %v2380_v33, %v2379_v53  ;;  %v2400_v30 = vsel %vm2310_vm4, %v2377_v12, %v2399_v60  ;;  %v5695_v12 = vld [vmem:[#allocation2 + $0x60] sm:$0x3]  ;;  %v6167_v26 = vld [vmem:[#allocation15_spill] sm:$0xff] }
 0x1ec   : > { %2736 = vmatprep.mubr.bf16.mxu1 %v2339_v63  ;;  %v2391_v14 = vsel %vm2310_vm4, %v2368_v10, %v2390_v54  ;;  %v2408_v27 = vrot.slane %v2406_v49, 1  ;;  %v2411_v47 = vrot.slane %v2409_v9, 2  ;;  %v2428_v63 = vshrl.u32 %v2204_v1, 16 }
 0x1ed   : > { %v2420_v15 = vrot.slane %v2418_v2, 2  ;;  %v2207_v11 = vor.u32 %v2205_v39, %v2203_v22  ;;  %v2382_v8 = vsel %vm2310_vm4, %v2359_v32, %v2381_v25  ;;  %v2401_v41 = vrot.slane %v2189_v51, 1 }
 0x1ee   : > { %4213 = vmatmul.mubr.bf16.gmra.mrb[92].mxu0 %v5458_v6  ;;  %v2356_v6 = vsel %vm2310_vm4, %v2347_v35, %v2355_v7  ;;  %v2412_v3 = vor.u32 %v2411_v47, %v2408_v27  ;;  %v2431_v35 = vshll.u32 %v2204_v1, 16  ;;  %v2254_v7 = vsel %vm950_vm1, %v2251_v16, %v2253_v55 }
 0x1ef   : > { %4232 = vmatprep.mubr.msk.bf16.mxu0 %vm4543_vm0, %v6118_v38  ;;  %v2402_v34 = vrot.slane %v2185_v21, 2  ;;  %v2440_v10 = vshll.u32 %v2254_v7, 16  ;;  %v2430_v29 = vrot.slane %v2428_v63, 1  ;;  %v2421_v43 = vor.u32 %v2420_v15, %v2417_v4 }
 0x1f0   : > { %v2413_v23 = vsel %vm2310_vm4, %v2390_v54, %v2412_v3  ;;  %v2433_v19 = vrot.slane %v2431_v35, 2  ;;  %v2212_v61 = vsel %vm868_vm2, %v2207_v11, %v6166_v42  ;;  %v2217_v51 = vshll.u32 %v5679_v52, 16 }
 0x1f1   : > { %v2403_v20 = vor.u32 %v2402_v34, %v2401_v41  ;;  %v2442_v37 = vrot.slane %v2440_v10, 2  ;;  %v2450_v24 = vshrl.u32 %v2212_v61, 16  ;;  %v2453_v45 = vshll.u32 %v2212_v61, 16 }
 0x1f2   : > { %v2434_v13 = vor.u32 %v2433_v19, %v2430_v29  ;;  %v2219_v46 = vrot.slane %v2217_v51, 1  ;;  %v2423_v16 = vrot.slane %v2197_v5, 1  ;;  %v2424_v32 = vrot.slane %v2193_v40, 2 }
 0x1f3   : > { %2737 = vmatmul.mubr.bf16.vlgmr.msra.gmra.mrb[72].mxu1 %v2322_v48  ;;  %v2255_v48 = vrot.slane %v4498_v31, 1  ;;  %v2404_v18 = vsel %vm2310_vm4, %v2381_v25, %v2403_v20  ;;  %v2452_v54 = vrot.slane %v2450_v24, 1  ;;  %v2455_v49 = vrot.slane %v2453_v45, 2 }
 0x1f4   : > { %2744 = vmatprep.mubr.bf16.mxu1 %v2369_v58  ;;  %v2422_v58 = vsel %vm2310_vm4, %v2399_v60, %v2421_v43  ;;  %v2435_v59 = vsel %vm2310_vm4, %v2412_v3, %v2434_v13  ;;  %v2220_v22 = vsel %vm868_vm2, %v6167_v26, %v2219_v46  ;;  %v2221_v53 = vshrl.u32 %v5679_v52, 16  ;;  %v2152_v3 = vld [vmem:[#allocation2 + $0x60] sm:$0x7] }
 0x1f5   : > { %v2256_v0 = vsel %vm950_vm1, %v2253_v55, %v2255_v48  ;;  %v2225_v5 = vshll.u32 %v5695_v12, 16  ;;  %v2425_v40 = vor.u32 %v2424_v32, %v2423_v16  ;;  %v2456_v28 = vor.u32 %v2455_v49, %v2452_v54 }
 0x1f6   : > { %4233 = vmatmul.mubr.bf16.vlgmr.msra.gmra.mrb[96].mxu0 %v2356_v6  ;;  %v2437_v6 = vshrl.u32 %v2254_v7, 16  ;;  %v2459_v9 = vshrl.u32 %v2256_v0, 16  ;;  %v2475_v60 = vshll.u32 %v2220_v22, 16  ;;  %v2223_v47 = vor.u32 %v2221_v53, %v2219_v46  ;;  %v4489_v46 = vld [vmem:[%s6031_s6] sm:$0xff]  }
 0x1f7   : > { %4236 = vmatprep.mubr.msk.bf16.mxu0 %vm4543_vm0, %v6118_v38  ;;  %v2227_v55 = vrot.slane %v2225_v5, 1  ;;  %v2258_v50 = vsel %vm950_vm1, %v2255_v48, %v2257_v44  ;;  %v2426_v2 = vsel %vm2310_vm4, %v2403_v20, %v2425_v40  ;;  %v2445_v1 = vrot.slane %v2205_v39, 1  ;;  %4328 = vmatpush3.bf16.msra.mxu1 %v4489_v46 }
 0x1f8   : > { %v2439_v21 = vrot.slane %v2437_v6, 1  ;;  %v2446_v25 = vrot.slane %v2201_v36, 2  ;;  %v2457_v63 = vsel %vm2310_vm4, %v2434_v13, %v2456_v28  ;;  %v2477_v7 = vrot.slane %v2475_v60, 2  ;;  %4269 = vmatpush3.bf16.msra.mxu0 %v4489_v46  ;;  %4321 = vmatprep.subr.bf16.mxu1 %v6118_v38 }
 0x1f9   : > { %v2481_v4 = vshrl.u32 %v2258_v50, 16  ;;  %v2484_v15 = vshll.u32 %v2258_v50, 16  ;;  %v2228_v11 = vsel %vm868_vm2, %v2223_v47, %v2227_v55  ;;  %v2229_v34 = vshrl.u32 %v5695_v12, 16  ;;  %4270 = vmatprep.subr.bf16.mxu0 %v6118_v38 }
 0x1fa   : > { %v2443_v17 = vor.u32 %v2442_v37, %v2439_v21  ;;  %v2447_v39 = vor.u32 %v2446_v25, %v2445_v1  ;;  %v2494_v36 = vshrl.u32 %v2228_v11, 16  ;;  %v2497_v41 = vshll.u32 %v2228_v11, 16 }
 0x1fb   : > { %2745 = vmatmul.mubr.bf16.gmra.mrb[76].mxu1 %v2360_v56  ;;  %v2472_v56 = vshrl.u32 %v2220_v22, 16  ;;  %v2483_v10 = vrot.slane %v2481_v4, 1  ;;  %v2231_v13 = vor.u32 %v2229_v34, %v2227_v55  ;;  %v2511_v47 = vrot.slane %v2229_v34, 1 }
 0x1fc   : > { %2752 = vmatprep.mubr.bf16.mxu1 %v2391_v14  ;;  %v2444_v33 = vsel %vm2310_vm4, %v2421_v43, %v2443_v17  ;;  %v2461_v14 = vrot.slane %v2459_v9, 1  ;;  %v2448_v19 = vsel %vm2310_vm4, %v2425_v40, %v2447_v39  ;;  %v6168_v43 = vld [vmem:[#allocation13_spill] sm:$0xff]  ;;  %v2496_v21 = vrot.slane %v2494_v36, 1 }
 0x1fd   : > { %v2474_v35 = vrot.slane %v2472_v56, 1  ;;  %v6169_v42 = vshrl.u32 %v6168_v43, 16  ;;  %v6170_v31 = vshll.u32 %v6168_v43, 16  ;;  %v2499_v37 = vrot.slane %v2497_v41, 2 }
 0x1fe   : > { %4237 = vmatmul.mubr.bf16.gmra.mrb[100].mxu0 %v2378_v62  ;;  %v2462_v62 = vshll.u32 %v2256_v0, 16  ;;  %v2516_v16 = vshrl.u32 %v2231_v13, 16  ;;  %v2519_v32 = vshll.u32 %v2231_v13, 16  ;;  %v2489_v9 = vrot.slane %v2221_v53, 1  ;;  %v4490_v53 = vld [vmem:[%s6031_s6 + $0x8] sm:$0xff]  }
 0x1ff   : > { %4240 = vmatprep.mubr.msk.bf16.mxu0 %vm4543_vm0, %v6118_v38  ;;  %v2478_v57 = vor.u32 %v2477_v7, %v2474_v35  ;;  %v2467_v61 = vrot.slane %v6169_v42, 1  ;;  %v2468_v48 = vrot.slane %v6170_v31, 2  ;;  %4329 = vmatpush3.bf16.msra.mxu1 %v4490_v53  ;;  %v2512_v55 = vrot.slane %v2225_v5, 2 }
 0x200   : > { %v2464_v27 = vrot.slane %v2462_v62, 2  ;;  %v2490_v62 = vrot.slane %v2217_v51, 2  ;;  %v2518_v22 = vrot.slane %v2516_v16, 1  ;;  %4271 = vmatpush3.bf16.msra.mxu0 %v4490_v53  ;;  %4322 = vmatprep.subr.bf16.mxu1 %v6118_v38  ;;  %v4496_v53 = vld [vmem:[%s6031_s6 + $0x38] sm:$0xff]  }
 0x201   : > { %v2479_v20 = vsel %vm2310_vm4, %v2456_v28, %v2478_v57  ;;  %v2469_v0 = vor.u32 %v2468_v48, %v2467_v61  ;;  %4272 = vmatprep.subr.bf16.mxu0 %v6118_v38  ;;  %v2513_v1 = vor.u32 %v2512_v55, %v2511_v47 }
 0x202   : > { %v2491_v56 = vor.u32 %v2490_v62, %v2489_v9  ;;  %v4495_v62 = vld [vmem:[%s6031_s6 + $0x30] sm:$0xff]  }
 0x203   : > { %2753 = vmatmul.mubr.bf16.gmra.mrb[80].mxu1 %v2382_v8  ;;  %v2259_v8 = vrot.slane %v2152_v3, 1  ;;  %v2470_v49 = vsel %vm2310_vm4, %v2447_v39, %v2469_v0  ;;  %v4491_v3 = vld [vmem:[%s6031_s6 + $0x10] sm:$0xff]  }
 0x204   : > { %2760 = vmatprep.mubr.bf16.mxu1 %v2413_v23  ;;  %v2486_v23 = vrot.slane %v2484_v15, 2  ;;  %4330 = vmatpush3.bf16.msra.mxu1 %v4491_v3 }
 0x205   : > { %v2260_v29 = vsel %vm950_vm1, %v2257_v44, %v2259_v8  ;;  %v2521_v44 = vrot.slane %v2519_v32, 2  ;;  %v2528_v28 = vshll.u32 %v2259_v8, 16  ;;  %4273 = vmatpush3.bf16.msra.mxu0 %v4491_v3  ;;  %4323 = vmatprep.subr.bf16.mxu1 %v6118_v38 }
 0x206   : > { %4241 = vmatmul.mubr.bf16.gmra.mrb[104].mxu0 %v2400_v30  ;;  %v2465_v30 = vor.u32 %v2464_v27, %v2461_v14  ;;  %v2487_v24 = vor.u32 %v2486_v23, %v2483_v10  ;;  %v2503_v45 = vshrl.u32 %v2260_v29, 16  ;;  %v2492_v27 = vsel %vm2310_vm4, %v2469_v0, %v2491_v56  ;;  %4274 = vmatprep.subr.bf16.mxu0 %v6118_v38 }
 0x207   : > { %4244 = vmatprep.mubr.msk.bf16.mxu0 %vm4543_vm0, %v6118_v38  ;;  %v2522_v52 = vor.u32 %v2521_v44, %v2518_v22  ;;  %v2530_v14 = vrot.slane %v2528_v28, 2 }
 0x208   : > { %v2466_v6 = vsel %vm2310_vm4, %v2443_v17, %v2465_v30  ;;  %v2488_v17 = vsel %vm2310_vm4, %v2465_v30, %v2487_v24  ;;  %v4492_v30 = vld [vmem:[%s6031_s6 + $0x18] sm:$0xff]  }
 0x209   : > { %4331 = vmatpush3.bf16.msra.mxu1 %v4492_v30  ;;  %4275 = vmatpush3.bf16.msra.mxu0 %v4492_v30 }
 0x20a   : > { %4324 = vmatprep.subr.bf16.mxu1 %v6118_v38  ;;  %4276 = vmatprep.subr.bf16.mxu0 %v6118_v38 }
 0x20b   : > { %2761 = vmatmul.mubr.bf16.gmra.mrb[84].mxu1 %v2404_v18  ;;  %v2500_v18 = vor.u32 %v2499_v37, %v2496_v21 }
 0x20c   : > { %2768 = vmatprep.mubr.bf16.mxu1 %v2435_v59  ;;  %v2505_v59 = vrot.slane %v2503_v45, 1 }
 0x20d   : > { %v2501_v26 = vsel %vm2310_vm4, %v2478_v57, %v2500_v18  ;;  %v2523_v50 = vsel %vm2310_vm4, %v2500_v18, %v2522_v52 }
 0x20e   : > { %4245 = vmatmul.mubr.bf16.gmra.mrb[108].mxu0 %v2422_v58  ;;  %v2506_v58 = vshll.u32 %v2260_v29, 16  ;;  %v4493_v29 = vld [vmem:[%s6031_s6 + $0x20] sm:$0xff]  }
 0x20f   : > { %4248 = vmatprep.mubr.msk.bf16.mxu0 %vm4543_vm0, %v6118_v38  ;;  %4332 = vmatpush3.bf16.msra.mxu1 %v4493_v29 }
 0x210   : > { %v2508_v54 = vrot.slane %v2506_v58, 2  ;;  %4277 = vmatpush3.bf16.msra.mxu0 %v4493_v29  ;;  %4325 = vmatprep.subr.bf16.mxu1 %v6118_v38  ;;  %v4494_v58 = vld [vmem:[%s6031_s6 + $0x28] sm:$0xff]  }
 0x211   : > { %4278 = vmatprep.subr.bf16.mxu0 %v6118_v38 }
 0x212   : > { %v2509_v40 = vor.u32 %v2508_v54, %v2505_v59 }
 0x213   : > { %2769 = vmatmul.mubr.bf16.gmra.mrb[88].mxu1 %v2426_v2 }
 0x214   : > { %2776 = vmatprep.mubr.bf16.mxu1 %v2457_v63  ;;  %v2510_v51 = vsel %vm2310_vm4, %v2487_v24, %v2509_v40  ;;  %v2514_v63 = vsel %vm2310_vm4, %v2491_v56, %v2513_v1  ;;  %4333 = vmatpush3.bf16.msra.mxu1 %v4494_v58 }
 0x215   : > { %4279 = vmatpush3.bf16.msra.mxu0 %v4494_v58  ;;  %4326 = vmatprep.subr.bf16.mxu1 %v6118_v38 }
 0x216   : > { %4249 = vmatmul.mubr.bf16.gmra.mrb[112].mxu0 %v2444_v33  ;;  %v2525_v33 = vshrl.u32 %v2259_v8, 16  ;;  %4280 = vmatprep.subr.bf16.mxu0 %v6118_v38 }
 0x217   : > { %4252 = vmatprep.mubr.msk.bf16.mxu0 %vm4543_vm0, %v6118_v38 }
 0x218   : > { %v2527_v60 = vrot.slane %v2525_v33, 1  ;;  %4334 = vmatpush3.bf16.msra.mxu1 %v4495_v62 }
 0x219   : > { %4281 = vmatpush3.bf16.msra.mxu0 %v4495_v62  ;;  %4327 = vmatprep.subr.bf16.mxu1 %v6118_v38 }
 0x21a   : > { %v2531_v2 = vor.u32 %v2530_v14, %v2527_v60  ;;  %4282 = vmatprep.subr.bf16.mxu0 %v6118_v38 }
 0x21b   : > { %2777 = vmatmul.mubr.bf16.gmra.mrb[92].mxu1 %v2448_v19 }
 0x21c   : > { %2784 = vmatprep.mubr.bf16.mxu1 %v2479_v20  ;;  %v2532_v25 = vsel %vm2310_vm4, %v2509_v40, %v2531_v2  ;;  %4335 = vmatpush3.bf16.msra.mxu1 %v4496_v53 }
 0x21d   : > { %4283 = vmatpush3.bf16.msra.mxu0 %v4496_v53 }
 0x21e   : > { %4253 = vmatmul.mubr.bf16.gmra.mrb[116].mxu0 %v2466_v6 }
 0x21f   : > { %4256 = vmatprep.mubr.msk.bf16.mxu0 %vm4543_vm0, %v6118_v38 }
 0x223   : > { %2785 = vmatmul.mubr.bf16.gmra.mrb[96].mxu1 %v2470_v49 }
 0x224   : > { %2792 = vmatprep.mubr.bf16.mxu1 %v2501_v26 }
 0x226   : > { %4257 = vmatmul.mubr.bf16.gmra.mrb[120].mxu0 %v2488_v17 }
 0x227   : > { %4260 = vmatprep.mubr.msk.bf16.mxu0 %vm4543_vm0, %v6118_v38 }
 0x22b   : > { %2793 = vmatmul.mubr.bf16.gmra.mrb[100].mxu1 %v2492_v27 }
 0x22c   : > { %2800 = vmatprep.mubr.bf16.mxu1 %v2523_v50 }
 0x22e   : > { %4261 = vmatmul.mubr.bf16.gmra.mrb[124].mxu0 %v2510_v51 }
 0x22f   : > { %4264 = vmatprep.mubr.msk.bf16.mxu0 %vm4543_vm0, %v6118_v38 }
 0x233   : > { %2801 = vmatmul.mubr.bf16.gmra.mrb[104].mxu1 %v2514_v63 }
 0x234   : > { %4288 = vmatprep.mubr.msk.bf16.mxu1 %vm4543_vm0, %v6118_v38 }
 0x236   : > { %4265 = vmatmul.mubr.bf16.gmra.mrb[128].mxu0 %v2532_v25  ;;  %v3810_v35 = vpop.f32.mrb[0].mxu1 }
 0x237   : > { %4284 = vmatprep.mubr.msk.bf16.mxu0 %vm4543_vm0, %v6118_v38  ;;  %v1565_v12 = vpop.f32.mrb[24].mxu0  ;;  %v3811_v4 = vpop.f32.mrb[1].mxu1 }
 0x238   : > { %v4130_v5 = vpop.f32.mrb[25].mxu0  ;;  %v3812_v11 = vadd.f32 %v3811_v4, %v3810_v35  ;;  %v3813_v8 = vpop.f32.mrb[2].mxu1 }
 0x239   : > { %v1568_v7 = vpop.f32.mrb[26].mxu0  ;;  %v3814_v39 = vpop.f32.mrb[3].mxu1 }
 0x23a   : > { %v4131_v15 = vpop.f32.mrb[27].mxu0  ;;  %v5778_v57 = vadd.f32 %v3812_v11, %v1565_v12  ;;  %v3815_v36 = vadd.f32 %v3814_v39, %v3813_v8 }
 0x23c   : > { %v5780_v41 = vadd.f32 %v3815_v36, %v1568_v7 }
 0x23e   : > { %v3816_v10 = vpop.f32.mrb[4].mxu1 }
 0x23f   : > { %v1573_v34 = vpop.f32.mrb[28].mxu0  ;;  %v3817_v19 = vpop.f32.mrb[5].mxu1 }
 0x240   : > { %v4134_v6 = vpop.f32.mrb[29].mxu0  ;;  %v3818_v42 = vadd.f32 %v3817_v19, %v3816_v10  ;;  %v3819_v61 = vpop.f32.mrb[6].mxu1 }
 0x241   : > { %v1576_v23 = vpop.f32.mrb[30].mxu0  ;;  %v3820_v31 = vpop.f32.mrb[7].mxu1 }
 0x242   : > { %v4135_v43 = vpop.f32.mrb[31].mxu0  ;;  %v5787_v48 = vadd.f32 %v3818_v42, %v1573_v34  ;;  %v3821_v20 = vadd.f32 %v3820_v31, %v3819_v61 }
 0x244   : > { %v5789_v21 = vadd.f32 %v3821_v20, %v1576_v23 }
 0x246   : > { %v3822_v24 = vpop.f32.mrb[8].mxu1 }
 0x247   : > { %v1581_v37 = vpop.f32.mrb[32].mxu0  ;;  %v3823_v0 = vpop.f32.mrb[9].mxu1 }
 0x248   : > { %v4138_v13 = vpop.f32.mrb[33].mxu0  ;;  %v3824_v18 = vadd.f32 %v3823_v0, %v3822_v24  ;;  %v3825_v16 = vpop.f32.mrb[10].mxu1 }
 0x249   : > { %v1584_v45 = vpop.f32.mrb[34].mxu0  ;;  %v3826_v32 = vpop.f32.mrb[11].mxu1 }
 0x24a   : > { %v4139_v46 = vpop.f32.mrb[35].mxu0  ;;  %v5796_v17 = vadd.f32 %v3824_v18, %v1581_v37  ;;  %v3827_v59 = vadd.f32 %v3826_v32, %v3825_v16 }
 0x24c   : > { %v5798_v54 = vadd.f32 %v3827_v59, %v1584_v45 }
 0x24e   : > { %v3828_v26 = vpop.f32.mrb[12].mxu1 }
 0x24f   : > { %v1589_v49 = vpop.f32.mrb[36].mxu0  ;;  %v3829_v44 = vpop.f32.mrb[13].mxu1 }
 0x250   : > { %v4142_v9 = vpop.f32.mrb[37].mxu0  ;;  %v3830_v33 = vadd.f32 %v3829_v44, %v3828_v26  ;;  %v3831_v28 = vpop.f32.mrb[14].mxu1 }
 0x251   : > { %v1592_v22 = vpop.f32.mrb[38].mxu0  ;;  %v3832_v56 = vpop.f32.mrb[15].mxu1 }
 0x252   : > { %v4143_v40 = vpop.f32.mrb[39].mxu0  ;;  %v5808_v52 = vadd.f32 %v3830_v33, %v1589_v49  ;;  %v3833_v51 = vadd.f32 %v3832_v56, %v3831_v28 }
 0x254   : > { %v5810_v60 = vadd.f32 %v3833_v51, %v1592_v22 }
 0x256   : > { %v3834_v47 = vpop.f32.mrb[16].mxu1 }
 0x257   : > { %v1597_v14 = vpop.f32.mrb[40].mxu0  ;;  %v3835_v50 = vpop.f32.mrb[17].mxu1 }
 0x258   : > { %v4146_v27 = vpop.f32.mrb[41].mxu0  ;;  %v3836_v1 = vadd.f32 %v3835_v50, %v3834_v47  ;;  %v3837_v25 = vpop.f32.mrb[18].mxu1 }
 0x259   : > { %v1600_v55 = vpop.f32.mrb[42].mxu0  ;;  %v3838_v3 = vpop.f32.mrb[19].mxu1 }
 0x25a   : > { %v4147_v2 = vpop.f32.mrb[43].mxu0  ;;  %v5812_v63 = vadd.f32 %v3836_v1, %v1597_v14  ;;  %v3839_v12 = vadd.f32 %v3838_v3, %v3837_v25 }
 0x25c   : > { %v5814_v5 = vadd.f32 %v3839_v12, %v1600_v55 }
 0x25e   : > { %v3840_v30 = vpop.f32.mrb[20].mxu1 }
 0x25f   : > { %v1605_v35 = vpop.f32.mrb[44].mxu0  ;;  %v3841_v15 = vpop.f32.mrb[21].mxu1 }
 0x260   : > { %v4150_v7 = vpop.f32.mrb[45].mxu0  ;;  %v3842_v8 = vadd.f32 %v3841_v15, %v3840_v30  ;;  %v3843_v39 = vpop.f32.mrb[22].mxu1 }
 0x261   : > { %v1608_v4 = vpop.f32.mrb[46].mxu0  ;;  %v3844_v36 = vpop.f32.mrb[23].mxu1 }
 0x262   : > { %v4151_v11 = vpop.f32.mrb[47].mxu0  ;;  %v5816_v34 = vadd.f32 %v3842_v8, %v1605_v35  ;;  %v3845_v6 = vadd.f32 %v3844_v36, %v3843_v39 }
 0x264   : > { %v5818_v10 = vadd.f32 %v3845_v6, %v1608_v4 }
 0x266   : > { %v3846_v19 = vpop.f32.mrb[24].mxu1 }
 0x267   : > { %v1613_v23 = vpop.f32.mrb[48].mxu0  ;;  %v3847_v42 = vpop.f32.mrb[25].mxu1 }
 0x268   : > { %v4154_v29 = vpop.f32.mrb[49].mxu0  ;;  %v3848_v31 = vadd.f32 %v3847_v42, %v3846_v19  ;;  %v3849_v20 = vpop.f32.mrb[26].mxu1 }
 0x269   : > { %v1616_v43 = vpop.f32.mrb[50].mxu0  ;;  %v3850_v37 = vpop.f32.mrb[27].mxu1 }
 0x26a   : > { %v4155_v61 = vpop.f32.mrb[51].mxu0  ;;  %v5820_v13 = vadd.f32 %v3848_v31, %v1613_v23  ;;  %v3851_v24 = vadd.f32 %v3850_v37, %v3849_v20 }
 0x26c   : > { %v5822_v45 = vadd.f32 %v3851_v24, %v1616_v43 }
 0x26e   : > { %v3852_v46 = vpop.f32.mrb[28].mxu1 }
 0x26f   : > { %v3853_v16 = vpop.f32.mrb[29].mxu1 }
 0x270   : > { %v3854_v59 = vadd.f32 %v3853_v16, %v3852_v46  ;;  %v3855_v49 = vpop.f32.mrb[30].mxu1 }
 0x271   : > { %v1621_v58 = vpop.f32.mrb[52].mxu0  ;;  %v3856_v9 = vpop.f32.mrb[31].mxu1 }
 0x272   : > { %v4158_v0 = vpop.f32.mrb[53].mxu0  ;;  %v5824_v62 = vadd.f32 %v3854_v59, %v1621_v58  ;;  %v3857_v26 = vadd.f32 %v3856_v9, %v3855_v49 }
 0x273   : > { %v1624_v18 = vpop.f32.mrb[54].mxu0 }
 0x274   : > { %v4159_v32 = vpop.f32.mrb[55].mxu0  ;;  %v5826_v22 = vadd.f32 %v3857_v26, %v1624_v18 }
 0x276   : > { %v3858_v33 = vpop.f32.mrb[32].mxu1 }
 0x277   : > { %v3859_v56 = vpop.f32.mrb[33].mxu1 }
 0x278   : > { %v3860_v51 = vadd.f32 %v3859_v56, %v3858_v33  ;;  %v3861_v14 = vpop.f32.mrb[34].mxu1 }
 0x279   : > { %v1629_v44 = vpop.f32.mrb[56].mxu0  ;;  %v3862_v27 = vpop.f32.mrb[35].mxu1 }
 0x27a   : > { %v4162_v40 = vpop.f32.mrb[57].mxu0  ;;  %v5828_v47 = vadd.f32 %v3860_v51, %v1629_v44  ;;  %v3863_v55 = vadd.f32 %v3862_v27, %v3861_v14 }
 0x27b   : > { %v1632_v28 = vpop.f32.mrb[58].mxu0 }
 0x27c   : > { %v4163_v53 = vpop.f32.mrb[59].mxu0  ;;  %v5830_v50 = vadd.f32 %v3863_v55, %v1632_v28 }
 0x27e   : > { %v3897_v25 = vpop.f32.mrb[36].mxu1 }
 0x27f   : > { %v3898_v12 = vpop.f32.mrb[37].mxu1 }
 0x280   : > { %v3899_v7 = vadd.f32 %v3898_v12, %v3897_v25  ;;  %v3900_v30 = vpop.f32.mrb[38].mxu1 }
 0x281   : > { %v2070_v2 = vpop.f32.mrb[60].mxu0  ;;  %v3901_v4 = vpop.f32.mrb[39].mxu1 }
 0x282   : > { %v4182_v1 = vpop.f32.mrb[61].mxu0  ;;  %v1966_v15 = vadd.f32 %v3899_v7, %v5778_v57  ;;  %v3902_v11 = vadd.f32 %v3901_v4, %v3900_v30 }
 0x283   : > { %v2073_v3 = vpop.f32.mrb[62].mxu0 }
 0x284   : > { %v4183_v35 = vpop.f32.mrb[63].mxu0  ;;  %v5833_v8 = vadd.f32 %v2070_v2, %v1966_v15  ;;  %v1969_v39 = vadd.f32 %v3902_v11, %v5780_v41 }
 0x286   : > { %v5836_v23 = vadd.f32 %v2073_v3, %v1969_v39  ;;  %v3903_v29 = vpop.f32.mrb[40].mxu1 }
 0x287   : > { %v3904_v43 = vpop.f32.mrb[41].mxu1 }
 0x288   : > { %v3905_v61 = vadd.f32 %v3904_v43, %v3903_v29  ;;  %v3906_v31 = vpop.f32.mrb[42].mxu1 }
 0x289   : > { %v2078_v36 = vpop.f32.mrb[64].mxu0  ;;  %v3907_v20 = vpop.f32.mrb[43].mxu1 }
 0x28a   : > { %v4186_v6 = vpop.f32.mrb[65].mxu0  ;;  %v1974_v37 = vadd.f32 %v3905_v61, %v5787_v48  ;;  %v3908_v24 = vadd.f32 %v3907_v20, %v3906_v31 }
 0x28b   : > { %v2081_v19 = vpop.f32.mrb[66].mxu0 }
 0x28c   : > { %v4187_v42 = vpop.f32.mrb[67].mxu0  ;;  %v5839_v57 = vadd.f32 %v2078_v36, %v1974_v37  ;;  %v1977_v58 = vadd.f32 %v3908_v24, %v5789_v21 }
 0x28e   : > { %v5842_v46 = vadd.f32 %v2081_v19, %v1977_v58  ;;  %v3909_v18 = vpop.f32.mrb[44].mxu1 }
 0x28f   : > { %v3910_v32 = vpop.f32.mrb[45].mxu1 }
 0x290   : > { %v3911_v49 = vadd.f32 %v3910_v32, %v3909_v18  ;;  %v3912_v9 = vpop.f32.mrb[46].mxu1 }
 0x291   : > { %v2086_v0 = vpop.f32.mrb[68].mxu0  ;;  %v3913_v26 = vpop.f32.mrb[47].mxu1 }
 0x292   : > { %v4190_v41 = vpop.f32.mrb[69].mxu0  ;;  %v1982_v44 = vadd.f32 %v3911_v49, %v5796_v17  ;;  %v3914_v40 = vadd.f32 %v3913_v26, %v3912_v9 }
 0x293   : > { %v2089_v16 = vpop.f32.mrb[70].mxu0 }
 0x294   : > { %v4191_v59 = vpop.f32.mrb[71].mxu0  ;;  %v5845_v48 = vadd.f32 %v2086_v0, %v1982_v44  ;;  %v1985_v33 = vadd.f32 %v3914_v40, %v5798_v54 }
 0x296   : > { %v5848_v56 = vadd.f32 %v2089_v16, %v1985_v33  ;;  %v3915_v53 = vpop.f32.mrb[48].mxu1 }
 0x297   : > { %v3916_v14 = vpop.f32.mrb[49].mxu1 }
 0x298   : > { %v3917_v55 = vadd.f32 %v3916_v14, %v3915_v53  ;;  %v3918_v2 = vpop.f32.mrb[50].mxu1 }
 0x299   : > { %v2094_v28 = vpop.f32.mrb[72].mxu0  ;;  %v3919_v1 = vpop.f32.mrb[51].mxu1 }
 0x29a   : > { %v4194_v21 = vpop.f32.mrb[73].mxu0  ;;  %v1990_v25 = vadd.f32 %v3917_v55, %v5808_v52  ;;  %v3920_v3 = vadd.f32 %v3919_v1, %v3918_v2 }
 0x29b   : > { %v2097_v51 = vpop.f32.mrb[74].mxu0 }
 0x29c   : > { %v4195_v27 = vpop.f32.mrb[75].mxu0  ;;  %v5851_v17 = vadd.f32 %v2094_v28, %v1990_v25  ;;  %v1993_v12 = vadd.f32 %v3920_v3, %v5810_v60 }
 0x29e   : > { %v5854_v7 = vadd.f32 %v2097_v51, %v1993_v12  ;;  %v3921_v30 = vpop.f32.mrb[52].mxu1 }
 0x29f   : > { %v3922_v15 = vpop.f32.mrb[53].mxu1 }
 0x2a0   : > { %v3923_v39 = vadd.f32 %v3922_v15, %v3921_v30  ;;  %v3924_v36 = vpop.f32.mrb[54].mxu1 }
 0x2a1   : > { %v2102_v35 = vpop.f32.mrb[76].mxu0  ;;  %v3925_v6 = vpop.f32.mrb[55].mxu1 }
 0x2a2   : > { %v4198_v54 = vpop.f32.mrb[77].mxu0  ;;  %v1998_v29 = vadd.f32 %v3923_v39, %v5812_v63  ;;  %v3926_v19 = vadd.f32 %v3925_v6, %v3924_v36 }
 0x2a3   : > { %v2105_v4 = vpop.f32.mrb[78].mxu0 }
 0x2a4   : > { %v4199_v11 = vpop.f32.mrb[79].mxu0  ;;  %v5857_v52 = vadd.f32 %v2102_v35, %v1998_v29  ;;  %v2001_v43 = vadd.f32 %v3926_v19, %v5814_v5 }
 0x2a6   : > { %v5860_v61 = vadd.f32 %v2105_v4, %v2001_v43  ;;  %v3927_v31 = vpop.f32.mrb[56].mxu1 }
 0x2a7   : > { %v3928_v37 = vpop.f32.mrb[57].mxu1 }
 0x2a8   : > { %v3929_v58 = vadd.f32 %v3928_v37, %v3927_v31  ;;  %v3930_v0 = vpop.f32.mrb[58].mxu1 }
 0x2a9   : > { %v2110_v42 = vpop.f32.mrb[80].mxu0  ;;  %v3931_v41 = vpop.f32.mrb[59].mxu1 }
 0x2aa   : > { %v4202_v60 = vpop.f32.mrb[81].mxu0  ;;  %v2006_v18 = vadd.f32 %v3929_v58, %v5816_v34  ;;  %v3932_v16 = vadd.f32 %v3931_v41, %v3930_v0 }
 0x2ab   : > { %v2113_v20 = vpop.f32.mrb[82].mxu0 }
 0x2ac   : > { %v4203_v24 = vpop.f32.mrb[83].mxu0  ;;  %v5863_v63 = vadd.f32 %v2110_v42, %v2006_v18  ;;  %v2009_v32 = vadd.f32 %v3932_v16, %v5818_v10 }
 0x2ae   : > { %v5866_v49 = vadd.f32 %v2113_v20, %v2009_v32  ;;  %v3933_v9 = vpop.f32.mrb[60].mxu1 }
 0x2af   : > { %v3934_v44 = vpop.f32.mrb[61].mxu1 }
 0x2b0   : > { %v3935_v33 = vadd.f32 %v3934_v44, %v3933_v9  ;;  %v3936_v28 = vpop.f32.mrb[62].mxu1 }
 0x2b1   : > { %v2118_v59 = vpop.f32.mrb[84].mxu0  ;;  %v3937_v21 = vpop.f32.mrb[63].mxu1 }
 0x2b2   : > { %v4206_v5 = vpop.f32.mrb[85].mxu0  ;;  %v2014_v53 = vadd.f32 %v3935_v33, %v5820_v13  ;;  %v3938_v51 = vadd.f32 %v3937_v21, %v3936_v28 }
 0x2b3   : > { %v2121_v26 = vpop.f32.mrb[86].mxu0 }
 0x2b4   : > { %v4207_v40 = vpop.f32.mrb[87].mxu0  ;;  %v5869_v34 = vadd.f32 %v2118_v59, %v2014_v53  ;;  %v2017_v14 = vadd.f32 %v3938_v51, %v5822_v45 }
 0x2b6   : > { %v5872_v55 = vadd.f32 %v2121_v26, %v2017_v14  ;;  %v3939_v2 = vpop.f32.mrb[64].mxu1 }
 0x2b7   : > { %v3940_v25 = vpop.f32.mrb[65].mxu1 }
 0x2b8   : > { %v3941_v12 = vadd.f32 %v3940_v25, %v3939_v2  ;;  %v3942_v35 = vpop.f32.mrb[66].mxu1 }
 0x2b9   : > { %v2126_v27 = vpop.f32.mrb[88].mxu0  ;;  %v3943_v54 = vpop.f32.mrb[67].mxu1 }
 0x2ba   : > { %v4210_v10 = vpop.f32.mrb[89].mxu0  ;;  %v2022_v30 = vadd.f32 %v3941_v12, %v5824_v62  ;;  %v3944_v4 = vadd.f32 %v3943_v54, %v3942_v35 }
 0x2bb   : > { %v2129_v1 = vpop.f32.mrb[90].mxu0 }
 0x2bc   : > { %v4211_v3 = vpop.f32.mrb[91].mxu0  ;;  %v5875_v13 = vadd.f32 %v2126_v27, %v2022_v30  ;;  %v2025_v15 = vadd.f32 %v3944_v4, %v5826_v22 }
 0x2be   : > { %v5878_v39 = vadd.f32 %v2129_v1, %v2025_v15  ;;  %v3945_v36 = vpop.f32.mrb[68].mxu1 }
 0x2bf   : > { %v3946_v29 = vpop.f32.mrb[69].mxu1 }
 0x2c0   : > { %v3947_v43 = vadd.f32 %v3946_v29, %v3945_v36  ;;  %v3948_v42 = vpop.f32.mrb[70].mxu1 }
 0x2c1   : > { %v2134_v11 = vpop.f32.mrb[92].mxu0  ;;  %v3949_v60 = vpop.f32.mrb[71].mxu1 }
 0x2c2   : > { %v4214_v45 = vpop.f32.mrb[93].mxu0  ;;  %v2030_v31 = vadd.f32 %v3947_v43, %v5828_v47  ;;  %v3950_v20 = vadd.f32 %v3949_v60, %v3948_v42  ;;  %v5889_v47 = vld [vmem:[%s6030_s5] ss:$0 sm:$0xff] }
 0x2c3   : > { %v2137_v6 = vpop.f32.mrb[94].mxu0 }
 0x2c4   : > { %v4215_v19 = vpop.f32.mrb[95].mxu0  ;;  %v5881_v62 = vadd.f32 %v2134_v11, %v2030_v31  ;;  %v2033_v37 = vadd.f32 %v3950_v20, %v5830_v50 }
 0x2c6   : > { %v5884_v58 = vadd.f32 %v2137_v6, %v2033_v37  ;;  %v3984_v0 = vpop.f32.mrb[72].mxu1 }
 0x2c7   : > { %v3985_v18 = vpop.f32.mrb[73].mxu1 }
 0x2c8   : > { %v3986_v32 = vadd.f32 %v3985_v18, %v3984_v0  ;;  %v3987_v59 = vpop.f32.mrb[74].mxu1 }
 0x2c9   : > { %v2843_v24 = vpop.f32.mrb[96].mxu0  ;;  %v3988_v5 = vpop.f32.mrb[75].mxu1 }
 0x2ca   : > { %v4234_v22 = vpop.f32.mrb[97].mxu0  ;;  %v2844_v9 = vadd.f32 %v3986_v32, %v2843_v24  ;;  %v3989_v26 = vadd.f32 %v3988_v5, %v3987_v59 }
 0x2cb   : > { %v2846_v41 = vpop.f32.mrb[98].mxu0 }
 0x2cc   : > { %v4235_v16 = vpop.f32.mrb[99].mxu0  ;;  %v2914_v50 = vadd.f32 %v2844_v9, %v5833_v8  ;;  %v2847_v44 = vadd.f32 %v3989_v26, %v2846_v41 }
 0x2ce   : > { %v2939_v28 = vadd.f32 %v5889_v47, %v2914_v50  ;;  %v2915_v21 = vadd.f32 %v2847_v44, %v5836_v23  ;;  %v3990_v53 = vpop.f32.mrb[76].mxu1 }
 0x2cf   : > { %v3991_v14 = vpop.f32.mrb[77].mxu1 }
 0x2d0   : > { %v2940_v10 = vadd.f32 %v5889_v47, %v2915_v21  ;;  %v3992_v2 = vadd.f32 %v3991_v14, %v3990_v53  ;;  %v3993_v1 = vpop.f32.mrb[78].mxu1  ;;  %v2957_v3 = vmax.f32 %v2939_v28, 0.0 }
 0x2d1   : > { %v2851_v40 = vpop.f32.mrb[100].mxu0  ;;  %v3994_v25 = vpop.f32.mrb[79].mxu1 }
 0x2d2   : > { %v4238_v33 = vpop.f32.mrb[101].mxu0  ;;  %v2958_v12 = vmax.f32 %v2940_v10, 0.0  ;;  %v2852_v35 = vadd.f32 %v3992_v2, %v2851_v40  ;;  %v3995_v8 = vadd.f32 %v3994_v25, %v3993_v1 }
 0x2d3   : > { %v2854_v51 = vpop.f32.mrb[102].mxu0 }
 0x2d4   : > { %v4239_v27 = vpop.f32.mrb[103].mxu0  ;;  %v2975_v54 = vpack.c.bf16 %v2958_v12, %v2957_v3  ;;  %v2916_v30 = vadd.f32 %v2852_v35, %v5839_v57  ;;  %v2855_v4 = vadd.f32 %v3995_v8, %v2854_v51 }
 0x2d6   : > { %v2941_v23 = vadd.f32 %v5889_v47, %v2916_v30  ;;  %v2917_v45 = vadd.f32 %v2855_v4, %v5842_v46  ;;  %v3996_v36 = vpop.f32.mrb[80].mxu1  ;;  %4285 = vmatmul.mubr.bf16.vlgmr.msra.gmra.mrb[132].mxu0 %v2975_v54 }
 0x2d7   : > { %v3997_v29 = vpop.f32.mrb[81].mxu1 }
 0x2d8   : > { %v2942_v43 = vadd.f32 %v5889_v47, %v2917_v45  ;;  %v3998_v42 = vadd.f32 %v3997_v29, %v3996_v36  ;;  %v3999_v60 = vpop.f32.mrb[82].mxu1  ;;  %v2959_v20 = vmax.f32 %v2941_v23, 0.0 }
 0x2d9   : > { %v2859_v15 = vpop.f32.mrb[104].mxu0  ;;  %v4000_v31 = vpop.f32.mrb[83].mxu1 }
 0x2da   : > { %v4242_v11 = vpop.f32.mrb[105].mxu0  ;;  %v2960_v37 = vmax.f32 %v2942_v43, 0.0  ;;  %v2860_v57 = vadd.f32 %v3998_v42, %v2859_v15  ;;  %v4001_v24 = vadd.f32 %v4000_v31, %v3999_v60 }
 0x2db   : > { %v2862_v6 = vpop.f32.mrb[106].mxu0 }
 0x2dc   : > { %v4243_v19 = vpop.f32.mrb[107].mxu0  ;;  %v2976_v22 = vpack.c.bf16 %v2960_v37, %v2959_v20  ;;  %v2918_v0 = vadd.f32 %v2860_v57, %v5845_v48  ;;  %v2863_v41 = vadd.f32 %v4001_v24, %v2862_v6 }
 0x2de   : > { %v2943_v16 = vadd.f32 %v5889_v47, %v2918_v0  ;;  %v2919_v32 = vadd.f32 %v2863_v41, %v5848_v56  ;;  %v4002_v59 = vpop.f32.mrb[84].mxu1  ;;  %4289 = vmatmul.mubr.bf16.vlgmr.msra.gmra.mrb[108].mxu1 %v2976_v22 }
 0x2df   : > { %v4003_v9 = vpop.f32.mrb[85].mxu1  ;;  %4292 = vmatprep.mubr.msk.bf16.mxu1 %vm4543_vm0, %v6118_v38 }
 0x2e0   : > { %v2944_v50 = vadd.f32 %v5889_v47, %v2919_v32  ;;  %v4004_v44 = vadd.f32 %v4003_v9, %v4002_v59  ;;  %v4005_v40 = vpop.f32.mrb[86].mxu1  ;;  %v2961_v33 = vmax.f32 %v2943_v16, 0.0 }
 0x2e1   : > { %v2867_v18 = vpop.f32.mrb[108].mxu0  ;;  %v4006_v48 = vpop.f32.mrb[87].mxu1 }
 0x2e2   : > { %v4246_v46 = vpop.f32.mrb[109].mxu0  ;;  %v2962_v28 = vmax.f32 %v2944_v50, 0.0  ;;  %v2868_v21 = vadd.f32 %v4004_v44, %v2867_v18  ;;  %v4007_v53 = vadd.f32 %v4006_v48, %v4005_v40 }
 0x2e3   : > { %v2870_v5 = vpop.f32.mrb[110].mxu0 }
 0x2e4   : > { %v4247_v26 = vpop.f32.mrb[111].mxu0  ;;  %v2920_v51 = vadd.f32 %v2868_v21, %v5851_v17  ;;  %v2871_v56 = vadd.f32 %v4007_v53, %v2870_v5  ;;  %v2977_v14 = vpack.c.bf16 %v2962_v28, %v2961_v33 }
 0x2e6   : > { %v2945_v2 = vadd.f32 %v5889_v47, %v2920_v51  ;;  %v2921_v1 = vadd.f32 %v2871_v56, %v5854_v7  ;;  %v4008_v25 = vpop.f32.mrb[88].mxu1  ;;  %4293 = vmatmul.mubr.bf16.gmra.mrb[112].mxu1 %v2977_v14 }
 0x2e7   : > { %v4009_v12 = vpop.f32.mrb[89].mxu1  ;;  %4296 = vmatprep.mubr.msk.bf16.mxu1 %vm4543_vm0, %v6118_v38 }
 0x2e8   : > { %v2946_v8 = vadd.f32 %v5889_v47, %v2921_v1  ;;  %v4010_v54 = vadd.f32 %v4009_v12, %v4008_v25  ;;  %v4011_v17 = vpop.f32.mrb[90].mxu1  ;;  %v2963_v4 = vmax.f32 %v2945_v2, 0.0 }
 0x2e9   : > { %v2875_v27 = vpop.f32.mrb[112].mxu0  ;;  %v4012_v30 = vpop.f32.mrb[91].mxu1 }
 0x2ea   : > { %v4250_v10 = vpop.f32.mrb[113].mxu0  ;;  %v2964_v15 = vmax.f32 %v2946_v8, 0.0  ;;  %v2876_v11 = vadd.f32 %v4010_v54, %v2875_v27  ;;  %v4013_v23 = vadd.f32 %v4012_v30, %v4011_v17 }
 0x2eb   : > { %v2878_v3 = vpop.f32.mrb[114].mxu0 }
 0x2ec   : > { %v4251_v35 = vpop.f32.mrb[115].mxu0  ;;  %v2922_v45 = vadd.f32 %v2876_v11, %v5857_v52  ;;  %v2879_v7 = vadd.f32 %v4013_v23, %v2878_v3  ;;  %v2978_v36 = vpack.c.bf16 %v2964_v15, %v2963_v4 }
 0x2ee   : > { %v2947_v19 = vadd.f32 %v5889_v47, %v2922_v45  ;;  %v2923_v43 = vadd.f32 %v2879_v7, %v5860_v61  ;;  %v4014_v42 = vpop.f32.mrb[92].mxu1  ;;  %4297 = vmatmul.mubr.bf16.gmra.mrb[116].mxu1 %v2978_v36 }
 0x2ef   : > { %v4015_v31 = vpop.f32.mrb[93].mxu1  ;;  %4300 = vmatprep.mubr.msk.bf16.mxu1 %vm4543_vm0, %v6118_v38 }
 0x2f0   : > { %v2948_v37 = vadd.f32 %v5889_v47, %v2923_v43  ;;  %v4016_v57 = vadd.f32 %v4015_v31, %v4014_v42  ;;  %v4017_v52 = vpop.f32.mrb[94].mxu1  ;;  %v2965_v22 = vmax.f32 %v2947_v19, 0.0 }
 0x2f1   : > { %v2883_v6 = vpop.f32.mrb[116].mxu0  ;;  %v4018_v24 = vpop.f32.mrb[95].mxu1 }
 0x2f2   : > { %v4254_v29 = vpop.f32.mrb[117].mxu0  ;;  %v2966_v0 = vmax.f32 %v2948_v37, 0.0  ;;  %v2884_v41 = vadd.f32 %v4016_v57, %v2883_v6  ;;  %v4019_v18 = vadd.f32 %v4018_v24, %v4017_v52 }
 0x2f3   : > { %v2886_v60 = vpop.f32.mrb[118].mxu0 }
 0x2f4   : > { %v4255_v20 = vpop.f32.mrb[119].mxu0  ;;  %v2924_v46 = vadd.f32 %v2884_v41, %v5863_v63  ;;  %v2887_v61 = vadd.f32 %v4019_v18, %v2886_v60  ;;  %v2979_v16 = vpack.c.bf16 %v2966_v0, %v2965_v22 }
 0x2f6   : > { %v2949_v5 = vadd.f32 %v5889_v47, %v2924_v46  ;;  %v2925_v9 = vadd.f32 %v2887_v61, %v5866_v49  ;;  %v4020_v26 = vpop.f32.mrb[96].mxu1  ;;  %4301 = vmatmul.mubr.bf16.gmra.mrb[120].mxu1 %v2979_v16 }
 0x2f7   : > { %v4021_v44 = vpop.f32.mrb[97].mxu1  ;;  %4304 = vmatprep.mubr.msk.bf16.mxu1 %vm4543_vm0, %v6118_v38 }
 0x2f8   : > { %v2950_v48 = vadd.f32 %v5889_v47, %v2925_v9  ;;  %v4022_v33 = vadd.f32 %v4021_v44, %v4020_v26  ;;  %v4023_v63 = vpop.f32.mrb[98].mxu1  ;;  %v2967_v21 = vmax.f32 %v2949_v5, 0.0  ;;  %v6171_v9 = vld [vmem:[#allocation3_spill] sm:$0xff] }
 0x2f9   : > { %v2891_v32 = vpop.f32.mrb[120].mxu0  ;;  %v4024_v28 = vpop.f32.mrb[99].mxu1  ;;  %v3160_v26 = vunpack.c.l.bf16 %v6171_v9 }
 0x2fa   : > { %v4258_v59 = vpop.f32.mrb[121].mxu0  ;;  %v2968_v53 = vmax.f32 %v2950_v48, 0.0  ;;  %v2892_v51 = vadd.f32 %v4022_v33, %v2891_v32  ;;  %v4025_v56 = vadd.f32 %v4024_v28, %v4023_v63 }
 0x2fb   : > { %v2894_v50 = vpop.f32.mrb[122].mxu0 }
 0x2fc   : > { %v4259_v40 = vpop.f32.mrb[123].mxu0  ;;  %v2926_v14 = vadd.f32 %v2892_v51, %v5869_v34  ;;  %v2895_v49 = vadd.f32 %v4025_v56, %v2894_v50  ;;  %v2980_v27 = vpack.c.bf16 %v2968_v53, %v2967_v21  ;;  %v6172_v50 = vld [vmem:[#allocation4_spill] sm:$0xff]  ;;  %v6173_v56 = vld [vmem:[#allocation5_spill] sm:$0xff] }
 0x2fd   : > { %v3162_v44 = vunpack.c.l.bf16 %v6172_v50  ;;  %v3199_v40 = vrot.slane %v3160_v26, 2  ;;  %v3163_v63 = vunpack.c.h.bf16 %v6172_v50 }
 0x2fe   : > { %v2951_v1 = vadd.f32 %v5889_v47, %v2926_v14  ;;  %v2927_v25 = vadd.f32 %v2895_v49, %v5872_v55  ;;  %v4026_v3 = vpop.f32.mrb[100].mxu1  ;;  %4305 = vmatmul.mubr.bf16.gmra.mrb[124].mxu1 %v2980_v27  ;;  %v3164_v14 = vunpack.c.l.bf16 %v6173_v56 }
 0x2ff   : > { %v4027_v35 = vpop.f32.mrb[101].mxu1  ;;  %4308 = vmatprep.mubr.msk.bf16.mxu1 %vm4543_vm0, %v6118_v38 }
 0x300   : > { %v2952_v54 = vadd.f32 %v5889_v47, %v2927_v25  ;;  %v4028_v17 = vadd.f32 %v4027_v35, %v4026_v3  ;;  %v4029_v34 = vpop.f32.mrb[102].mxu1  ;;  %v2969_v4 = vmax.f32 %v2951_v1, 0.0  ;;  %v3206_v25 = vrot.slane %v3164_v14, 2 }
 0x301   : > { %v2899_v10 = vpop.f32.mrb[124].mxu0  ;;  %v4030_v30 = vpop.f32.mrb[103].mxu1 }
 0x302   : > { %v4262_v2 = vpop.f32.mrb[125].mxu0  ;;  %v2970_v15 = vmax.f32 %v2952_v54, 0.0  ;;  %v2900_v11 = vadd.f32 %v4028_v17, %v2899_v10  ;;  %v4031_v23 = vadd.f32 %v4030_v30, %v4029_v34  ;;  %v3165_v54 = vunpack.c.h.bf16 %v6173_v56 }
 0x303   : > { %v2902_v12 = vpop.f32.mrb[126].mxu0  ;;  %v3204_v2 = vrot.slane %v3163_v63, 2 }
 0x304   : > { %v4263_v8 = vpop.f32.mrb[127].mxu0  ;;  %v2928_v45 = vadd.f32 %v2900_v11, %v5875_v13  ;;  %v2903_v55 = vadd.f32 %v4031_v23, %v2902_v12  ;;  %v2981_v7 = vpack.c.bf16 %v2970_v15, %v2969_v4  ;;  %v6174_v11 = vld [vmem:[#allocation6_spill] sm:$0xff] }
 0x305   : > { %v3207_v15 = vsel %vm3198_vm5, %v3204_v2, %v3206_v25  ;;  %v3166_v23 = vunpack.c.l.bf16 %v6174_v11 }
 0x306   : > { %v2953_v29 = vadd.f32 %v5889_v47, %v2928_v45  ;;  %v2929_v19 = vadd.f32 %v2903_v55, %v5878_v39  ;;  %v4032_v43 = vpop.f32.mrb[104].mxu1  ;;  %4309 = vmatmul.mubr.bf16.gmra.mrb[128].mxu1 %v2981_v7 }
 0x307   : > { %v4033_v60 = vpop.f32.mrb[105].mxu1  ;;  %4312 = vmatprep.mubr.msk.bf16.mxu1 %vm4543_vm0, %v6118_v38 }
 0x308   : > { %v2954_v20 = vadd.f32 %v5889_v47, %v2929_v19  ;;  %v4034_v37 = vadd.f32 %v4033_v60, %v4032_v43  ;;  %v4035_v13 = vpop.f32.mrb[106].mxu1  ;;  %v2971_v52 = vmax.f32 %v2953_v29, 0.0  ;;  %v3210_v29 = vrot.slane %v3166_v23, 2 }
 0x309   : > { %v2907_v36 = vpop.f32.mrb[128].mxu0  ;;  %v4036_v57 = vpop.f32.mrb[107].mxu1 }
 0x30a   : > { %v4266_v6 = vpop.f32.mrb[129].mxu0  ;;  %v2972_v24 = vmax.f32 %v2954_v20, 0.0  ;;  %v2908_v22 = vadd.f32 %v4034_v37, %v2907_v36  ;;  %v4037_v0 = vadd.f32 %v4036_v57, %v4035_v13  ;;  %v3208_v36 = vrot.slane %v3165_v54, 2 }
 0x30b   : > { %v2910_v42 = vpop.f32.mrb[130].mxu0 }
 0x30c   : > { %v4267_v31 = vpop.f32.mrb[131].mxu0  ;;  %v2930_v41 = vadd.f32 %v2908_v22, %v5881_v62  ;;  %v2911_v39 = vadd.f32 %v4037_v0, %v2910_v42  ;;  %v2982_v18 = vpack.c.bf16 %v2972_v24, %v2971_v52  ;;  %v3161_v62 = vunpack.c.h.bf16 %v6171_v9  ;;  %v6175_v24 = vld [vmem:[#allocation7_spill] sm:$0xff] }
 0x30d   : > { %v3209_v60 = vsel %vm3198_vm5, %v3206_v25, %v3208_v36  ;;  %v3167_v31 = vunpack.c.h.bf16 %v6174_v11  ;;  %v3211_v52 = vsel %vm3198_vm5, %v3208_v36, %v3210_v29  ;;  %v3168_v22 = vunpack.c.l.bf16 %v6175_v24 }
 0x30e   : > { %v2955_v46 = vadd.f32 %v5889_v47, %v2930_v41  ;;  %v2931_v61 = vadd.f32 %v2911_v39, %v5884_v58  ;;  %4313 = vmatmul.mubr.bf16.gmra.mrb[132].mxu1 %v2982_v18  ;;  %v3200_v48 = vrot.slane %v3161_v62, 2  ;;  %v5947_v58 = vld [vmem:[%s6032_s7] ss:$0 sm:$0xff]  ;;  %v3169_v9 = vunpack.c.h.bf16 %v6175_v24 }
 0x30f   : > { %4316 = vmatprep.mubr.msk.bf16.mxu1 %vm4543_vm0, %v6118_v38  ;;  %v3202_v38 = vrot.slane %v3162_v44, 2  ;;  %v3212_v18 = vrot.slane %v3167_v31, 2 }
 0x310   : > { %v2956_v16 = vadd.f32 %v5889_v47, %v2931_v61  ;;  %v2973_v32 = vmax.f32 %v2955_v46, 0.0  ;;  %v3201_v33 = vsel %vm3198_vm5, %v3199_v40, %v3200_v48  ;;  %v3214_v61 = vrot.slane %v3168_v22, 2 }
 0x311   : > { %v3203_v51 = vsel %vm3198_vm5, %v3200_v48, %v3202_v38  ;;  %v3205_v8 = vsel %vm3198_vm5, %v3202_v38, %v3204_v2  ;;  %v6176_v48 = vld [vmem:[#allocation8_spill] sm:$0xff] }
 0x312   : > { %v2974_v59 = vmax.f32 %v2956_v16, 0.0  ;;  %v3215_v40 = vsel %vm3198_vm5, %v3212_v18, %v3214_v61  ;;  %v3170_v38 = vunpack.c.l.bf16 %v6176_v48 }
 0x314   : > { %v2983_v5 = vpack.c.bf16 %v2974_v59, %v2973_v32 }
 0x316   : > { %4317 = vmatmul.mubr.bf16.gmra.mrb[136].mxu1 %v2983_v5  ;;  %v3213_v5 = vsel %vm3198_vm5, %v3210_v29, %v3212_v18 }
 0x3a9   : > { %v3089_v47 = vpop.f32.mrb[132].mxu0 }
 0x3aa   : > { %v3090_v28 = vadd.f32 %v5947_v58, %v3089_v47  ;;  %v4286_v21 = vpop.f32.mrb[133].mxu0 }
 0x3ab   : > { %v3092_v53 = vpop.f32.mrb[134].mxu0 }
 0x3ac   : > { %v3254_v49 = vadd.f32 %v3201_v33, %v3090_v28  ;;  %v3093_v27 = vadd.f32 %v5947_v58, %v3092_v53  ;;  %v4287_v10 = vpop.f32.mrb[135].mxu0  ;;  %v3216_v28 = vrot.slane %v3169_v9, 2  ;;  %v3218_v53 = vrot.slane %v3170_v38, 2 }
 0x3ae   : > { %v3255_v1 = vadd.f32 %v3203_v51, %v3093_v27  ;;  %v3272_v3 = vmax.f32 %v3254_v49, 0.0  ;;  %v3217_v49 = vsel %vm3198_vm5, %v3214_v61, %v3216_v28  ;;  %v3171_v27 = vunpack.c.h.bf16 %v6176_v48 }
 0x3b0   : > { %v3273_v12 = vmax.f32 %v3255_v1, 0.0 }
 0x3b1   : > { %v3097_v35 = vpop.f32.mrb[108].mxu1 }
 0x3b2   : > { %v3724_v17 = vpack.c.bf16 %v3273_v12, %v3272_v3  ;;  %v3098_v34 = vadd.f32 %v5947_v58, %v3097_v35  ;;  %v4290_v30 = vpop.f32.mrb[109].mxu1  ;;  %v3219_v3 = vsel %vm3198_vm5, %v3216_v28, %v3218_v53  ;;  %v6177_v12 = vld [vmem:[#allocation9_spill] sm:$0xff] }
 0x3b3   : > { %v3100_v4 = vpop.f32.mrb[110].mxu1  ;;  %v3172_v35 = vunpack.c.l.bf16 %v6177_v12 }
 0x3b4   : > { %3725 = vst [vmem:[%s4650_s24] sm:$0xff] %v3724_v17   ;;  %v3256_v45 = vadd.f32 %v3205_v8, %v3098_v34  ;;  %v3101_v55 = vadd.f32 %v5947_v58, %v3100_v4  ;;  %v4291_v7 = vpop.f32.mrb[111].mxu1  ;;  %v3220_v34 = vrot.slane %v3171_v27, 2 }
 0x3b5   : > { %v3222_v4 = vrot.slane %v3172_v35, 2 }
 0x3b6   : > { %v3257_v6 = vadd.f32 %v3207_v15, %v3101_v55  ;;  %v3274_v19 = vmax.f32 %v3256_v45, 0.0  ;;  %v3221_v45 = vsel %vm3198_vm5, %v3218_v53, %v3220_v34  ;;  %v3173_v55 = vunpack.c.h.bf16 %v6177_v12 }
 0x3b8   : > { %v3275_v43 = vmax.f32 %v3257_v6, 0.0 }
 0x3b9   : > { %v3105_v42 = vpop.f32.mrb[112].mxu1 }
 0x3ba   : > { %v3729_v20 = vpack.c.bf16 %v3275_v43, %v3274_v19  ;;  %v3106_v37 = vadd.f32 %v5947_v58, %v3105_v42  ;;  %v4294_v13 = vpop.f32.mrb[113].mxu1  ;;  %v3223_v19 = vsel %vm3198_vm5, %v3220_v34, %v3222_v4  ;;  %v6178_v43 = vld [vmem:[#allocation10_spill] sm:$0xff] }
 0x3bb   : > { %v3108_v57 = vpop.f32.mrb[114].mxu1  ;;  %v3174_v42 = vunpack.c.l.bf16 %v6178_v43 }
 0x3bc   : > { %3766 = vst [vmem:[%s4650_s24 + $0x8] sm:$0xff] %v3729_v20   ;;  %v3258_v0 = vadd.f32 %v3209_v60, %v3106_v37  ;;  %v3109_v41 = vadd.f32 %v5947_v58, %v3108_v57  ;;  %v4295_v39 = vpop.f32.mrb[115].mxu1  ;;  %v3224_v37 = vrot.slane %v3173_v55, 2 }
 0x3bd   : > { %v3226_v57 = vrot.slane %v3174_v42, 2 }
 0x3be   : > { %v3259_v46 = vadd.f32 %v3211_v52, %v3109_v41  ;;  %v3276_v16 = vmax.f32 %v3258_v0, 0.0  ;;  %v3225_v0 = vsel %vm3198_vm5, %v3222_v4, %v3224_v37  ;;  %v3175_v41 = vunpack.c.h.bf16 %v6178_v43 }
 0x3c0   : > { %v3277_v32 = vmax.f32 %v3259_v46, 0.0 }
 0x3c1   : > { %v3113_v59 = vpop.f32.mrb[116].mxu1 }
 0x3c2   : > { %v3734_v26 = vpack.c.bf16 %v3277_v32, %v3276_v16  ;;  %v3114_v62 = vadd.f32 %v5947_v58, %v3113_v59  ;;  %v4298_v50 = vpop.f32.mrb[117].mxu1  ;;  %v3227_v16 = vsel %vm3198_vm5, %v3224_v37, %v3226_v57  ;;  %v6179_v32 = vld [vmem:[#allocation11_spill] sm:$0xff] }
 0x3c3   : > { %v3116_v44 = vpop.f32.mrb[118].mxu1  ;;  %v3176_v59 = vunpack.c.l.bf16 %v6179_v32 }
 0x3c4   : > { %3767 = vst [vmem:[%s4650_s24 + $0x10] sm:$0xff] %v3734_v26   ;;  %v3260_v47 = vadd.f32 %v3213_v5, %v3114_v62  ;;  %v3117_v33 = vadd.f32 %v5947_v58, %v3116_v44  ;;  %v4299_v63 = vpop.f32.mrb[119].mxu1  ;;  %v3228_v62 = vrot.slane %v3175_v41, 2 }
 0x3c5   : > { %v3230_v44 = vrot.slane %v3176_v59, 2 }
 0x3c6   : > { %v3261_v21 = vadd.f32 %v3215_v40, %v3117_v33  ;;  %v3278_v51 = vmax.f32 %v3260_v47, 0.0  ;;  %v3229_v47 = vsel %vm3198_vm5, %v3226_v57, %v3228_v62  ;;  %v3177_v33 = vunpack.c.h.bf16 %v6179_v32 }
 0x3c8   : > { %v3279_v56 = vmax.f32 %v3261_v21, 0.0 }
 0x3c9   : > { %v3121_v14 = vpop.f32.mrb[120].mxu1 }
 0x3ca   : > { %v3739_v10 = vpack.c.bf16 %v3279_v56, %v3278_v51  ;;  %v3122_v2 = vadd.f32 %v5947_v58, %v3121_v14  ;;  %v4302_v1 = vpop.f32.mrb[121].mxu1  ;;  %v3231_v51 = vsel %vm3198_vm5, %v3228_v62, %v3230_v44  ;;  %v6180_v56 = vld [vmem:[#allocation12_spill] sm:$0xff] }
 0x3cb   : > { %v3124_v25 = vpop.f32.mrb[122].mxu1  ;;  %v3178_v14 = vunpack.c.l.bf16 %v6180_v56 }
 0x3cc   : > { %3768 = vst [vmem:[%s4650_s24 + $0x18] sm:$0xff] %v3739_v10   ;;  %v3262_v8 = vadd.f32 %v3217_v49, %v3122_v2  ;;  %v3125_v54 = vadd.f32 %v5947_v58, %v3124_v25  ;;  %v4303_v17 = vpop.f32.mrb[123].mxu1  ;;  %v3232_v2 = vrot.slane %v3177_v33, 2 }
 0x3cd   : > { %v3234_v25 = vrot.slane %v3178_v14, 2 }
 0x3ce   : > { %v3263_v30 = vadd.f32 %v3219_v3, %v3125_v54  ;;  %v3280_v15 = vmax.f32 %v3262_v8, 0.0  ;;  %v3233_v8 = vsel %vm3198_vm5, %v3230_v44, %v3232_v2 }
 0x3cf   : > { %v3235_v4 = vsel %vm3198_vm5, %v3232_v2, %v3234_v25 }
 0x3d0   : > { %v3281_v11 = vmax.f32 %v3263_v30, 0.0 }
 0x3d1   : > { %v3129_v23 = vpop.f32.mrb[124].mxu1 }
 0x3d2   : > { %v3744_v7 = vpack.c.bf16 %v3281_v11, %v3280_v15  ;;  %v3130_v36 = vadd.f32 %v5947_v58, %v3129_v23  ;;  %v4306_v6 = vpop.f32.mrb[125].mxu1 }
 0x3d3   : > { %v3132_v29 = vpop.f32.mrb[126].mxu1 }
 0x3d4   : > { %3769 = vst [vmem:[%s4650_s24 + $0x20] sm:$0xff] %v3744_v7   ;;  %v3264_v60 = vadd.f32 %v3221_v45, %v3130_v36  ;;  %v3133_v31 = vadd.f32 %v5947_v58, %v3132_v29  ;;  %v4307_v20 = vpop.f32.mrb[127].mxu1 }
 0x3d6   : > { %v3265_v13 = vadd.f32 %v3223_v19, %v3133_v31  ;;  %v3282_v52 = vmax.f32 %v3264_v60, 0.0 }
 0x3d8   : > { %v3283_v24 = vmax.f32 %v3265_v13, 0.0 }
 0x3d9   : > { %v3137_v22 = vpop.f32.mrb[128].mxu1 }
 0x3da   : > { %v3749_v39 = vpack.c.bf16 %v3283_v24, %v3282_v52  ;;  %v3138_v18 = vadd.f32 %v5947_v58, %v3137_v22  ;;  %v4310_v46 = vpop.f32.mrb[129].mxu1 }
 0x3db   : > { %v3140_v61 = vpop.f32.mrb[130].mxu1 }
 0x3dc   : > { %3770 = vst [vmem:[%s4650_s24 + $0x28] sm:$0xff] %v3749_v39   ;;  %v3266_v5 = vadd.f32 %v3225_v0, %v3138_v18  ;;  %v3141_v9 = vadd.f32 %v5947_v58, %v3140_v61  ;;  %v4311_v26 = vpop.f32.mrb[131].mxu1 }
 0x3de   : > { %v3267_v50 = vadd.f32 %v3227_v16, %v3141_v9  ;;  %v3284_v40 = vmax.f32 %v3266_v5, 0.0 }
 0x3e0   : > { %v3285_v48 = vmax.f32 %v3267_v50, 0.0 }
 0x3e1   : > { %v3145_v38 = vpop.f32.mrb[132].mxu1 }
 0x3e2   : > { %v3754_v63 = vpack.c.bf16 %v3285_v48, %v3284_v40  ;;  %v3146_v28 = vadd.f32 %v5947_v58, %v3145_v38  ;;  %v4314_v21 = vpop.f32.mrb[133].mxu1 }
 0x3e3   : > { %v3148_v53 = vpop.f32.mrb[134].mxu1 }
 0x3e4   : > { %3771 = vst [vmem:[%s4650_s24 + $0x30] sm:$0xff] %v3754_v63   ;;  %v3268_v49 = vadd.f32 %v3229_v47, %v3146_v28  ;;  %v3149_v27 = vadd.f32 %v5947_v58, %v3148_v53  ;;  %v4315_v10 = vpop.f32.mrb[135].mxu1 }
 0x3e6   : > { %v3269_v1 = vadd.f32 %v3231_v51, %v3149_v27  ;;  %v3286_v3 = vmax.f32 %v3268_v49, 0.0 }
 0x3e8   : > { %v3287_v12 = vmax.f32 %v3269_v1, 0.0 }
 0x3e9   : > { %v3153_v35 = vpop.f32.mrb[136].mxu1 }
 0x3ea   : > { %v3759_v54 = vpack.c.bf16 %v3287_v12, %v3286_v3  ;;  %v3154_v17 = vadd.f32 %v5947_v58, %v3153_v35  ;;  %v4318_v34 = vpop.f32.mrb[137].mxu1 }
 0x3eb   : > { %v3156_v30 = vpop.f32.mrb[138].mxu1 }
 0x3ec   : > { %3772 = vst [vmem:[%s4650_s24 + $0x38] sm:$0xff] %v3759_v54   ;;  %v3270_v15 = vadd.f32 %v3233_v8, %v3154_v17  ;;  %v3157_v11 = vadd.f32 %v5947_v58, %v3156_v30  ;;  %v4319_v23 = vpop.f32.mrb[139].mxu1 }
 0x3ee   : > { %v3271_v45 = vadd.f32 %v3235_v4, %v3157_v11  ;;  %v3288_v55 = vmax.f32 %v3270_v15, 0.0 }
 0x3f0   : > { %v3289_v7 = vmax.f32 %v3271_v45, 0.0 }
 0x3f2   : > { %v3764_v36 = vpack.c.bf16 %v3289_v7, %v3288_v55 }
 0x3f4   : > { %3773 = vst [vmem:[%s4650_s24 + $0x40] sm:$0xff] %v3764_v36  }
 0x3f5 PF: > { %s18_s9 = sadd.s32 1, %s4537_s9   ;;  %s6181_s27 = smov %s4529_s29 }
 0x3f6   : > { %p15_p9 = scmp.ge.s32.totalorder %s18_s9, 6   ;;  %s6182_s28 = smov %s4533_s30 }
 0x3f7   : > { %s6183_s29 = smov %s6186_s10  ;;  %s6184_s30 = smov %s6190_s11 }
 0x3f8   :  { %17 = sbr.rel (!%p15_p9) target bundleno = 3 (0x3), region = 92 }

</bundles_post_ra>
